<compile_context>
chip_gen: v7x
topology: tpu7x:2x2x1
jax: 0.10.0
libtpu: 0.0.40
codegen_flags: <defaults>
</compile_context>

<pallas_src>
import functools
import math

import jax
import jax.numpy as jnp
import numpy as np
from jax.experimental import pallas as pl


# ------------------------------ in-kernel helpers ------------------------------

def _erf(x):
    # Abramowitz & Stegun 7.1.26 polynomial approximation (|error| < 1.5e-7);
    # keeps torch.nn.GELU(approximate='none') semantics without relying on an erf lowering.
    a1, a2, a3, a4, a5 = 0.254829592, -0.284496736, 1.421413741, -1.453152027, 1.061405429
    pp = 0.3275911
    sign = jnp.where(x >= 0.0, 1.0, -1.0)
    ax = jnp.abs(x)
    t = 1.0 / (1.0 + pp * ax)
    poly = ((((a5 * t + a4) * t + a3) * t + a2) * t + a1) * t
    return sign * (1.0 - poly * jnp.exp(-ax * ax))


def _gelu(x):
    return 0.5 * x * (1.0 + _erf(x * (1.0 / math.sqrt(2.0))))


def _layer_norm(x, g, b, eps=1e-5):
    mu = jnp.mean(x, axis=-1, keepdims=True)
    xc = x - mu
    var = jnp.mean(xc * xc, axis=-1, keepdims=True)
    return xc * jax.lax.rsqrt(var + eps) * g + b


def _group_onehot(n_items, n_groups, group_size, transpose=False):
    """selector[item, group] = 1.0 iff item // group_size == group (or its transpose).

    Built from 2-D iotas + compares; turns per-head reductions / broadcasts into tiny
    MXU matmuls instead of XLU cross-lane work.
    """
    shape = (n_groups, n_items) if transpose else (n_items, n_groups)
    item_dim = 1 if transpose else 0
    group_dim = 0 if transpose else 1
    item = jax.lax.broadcasted_iota(jnp.int32, shape, item_dim)
    grp = jax.lax.broadcasted_iota(jnp.int32, shape, group_dim)
    return ((item >= grp * group_size) & (item < (grp + 1) * group_size)).astype(jnp.float32)


# ------------------------------ parameter packing ------------------------------

def _align8(n):
    return (n + 7) // 8 * 8


def _param_layout(cfg):
    """Row offsets of every parameter inside the single (rows, 128) f32 slab."""
    H = cfg["hidden_dim"]
    mlp_h = cfg["mlp_hidden_ratio"] * H
    in_src = cfg["in_channels_src"]
    in_dst = cfg["in_channels_dst"]
    edge_dim = cfg["edge_attr_dim"] + cfg["trainable_size"]
    assert max(2 * H, mlp_h) <= 128, "packed-slab layout assumes widths <= 128 lanes"

    lay = {}
    r = 0
    for name, rows in (("emb_src_w", in_src), ("emb_dst_w", in_dst), ("w_e", edge_dim),
                       ("w_sq", H), ("w_kv", H), ("w_proj", H),
                       ("w_mlp1", H), ("w_mlp2", mlp_h)):
        lay[name] = r
        r += _align8(rows)
    vec_names = ("emb_src_b", "emb_dst_b", "ln_src_g", "ln_src_b", "ln_dst_g", "ln_dst_b",
                 "b_sq", "b_kv", "b_e", "b_proj", "ln_mlp_g", "ln_mlp_b", "b_mlp1", "b_mlp2")
    for i, nm in enumerate(vec_names):
        lay[nm] = r + i
    r += _align8(len(vec_names))
    return lay, r


def pack_mapper_params(params, cfg):
    """One-time host-side packing of all weights/biases into a lane-dense (rows,128) slab."""
    lay, rows = _param_layout(cfg)
    slab = np.zeros((rows, 128), np.float32)

    def put(name, arr):
        arr = np.asarray(arr, np.float32)
        if arr.ndim == 1:
            arr = arr[None, :]
        slab[lay[name]:lay[name] + arr.shape[0], :arr.shape[1]] = arr

    put("emb_src_w", params["emb_src_w"]); put("emb_src_b", params["emb_src_b"])
    put("emb_dst_w", params["emb_dst_w"]); put("emb_dst_b", params["emb_dst_b"])
    put("ln_src_g", params["ln_src_g"]); put("ln_src_b", params["ln_src_b"])
    put("ln_dst_g", params["ln_dst_g"]); put("ln_dst_b", params["ln_dst_b"])
    put("w_sq", np.concatenate([params["w_self"], params["w_q"]], axis=1))
    put("b_sq", np.concatenate([params["b_self"], params["b_q"]]))
    put("w_kv", np.concatenate([params["w_k"], params["w_v"]], axis=1))
    put("b_kv", np.concatenate([params["b_k"], params["b_v"]]))
    put("w_e", params["w_e"]); put("b_e", params["b_e"])
    put("w_proj", params["w_proj"]); put("b_proj", params["b_proj"])
    put("ln_mlp_g", params["ln_mlp_g"]); put("ln_mlp_b", params["ln_mlp_b"])
    put("w_mlp1", params["w_mlp1"]); put("b_mlp1", params["b_mlp1"])
    put("w_mlp2", params["w_mlp2"]); put("b_mlp2", params["b_mlp2"])
    return jnp.asarray(slab)


# ------------------------------ fused Pallas kernel ------------------------------

def _fused_mapper_kernel(x_dst_ref, x_src_e_ref, e_attr_ref, p_ref, o_ref, *,
                         lay, n_dst, k_deg, in_src, in_dst, edge_dim,
                         hidden, mlp_hidden, heads, head_dim):
    H = hidden
    f32 = jnp.float32
    dot = lambda a, b: jnp.dot(a, b, preferred_element_type=f32)

    def wmat(name, rows, cols=None):                      # static slice into the packed slab
        r = lay[name]
        return p_ref[r:r + rows, 0:(cols if cols is not None else H)]

    def vrow(name, cols=None):                            # (1, cols) bias / LN row
        r = lay[name]
        return p_ref[r:r + 1, 0:(cols if cols is not None else H)]

    # ---- destination-node path (carried 128-wide: cols >= H are exact zeros) ----
    h_dst = dot(x_dst_ref[...], wmat("emb_dst_w", in_dst, 128)) + vrow("emb_dst_b", 128)
    xd = _layer_norm(h_dst[:, 0:H], vrow("ln_dst_g"), vrow("ln_dst_b"))
    sq = dot(xd, wmat("w_sq", H, 2 * H)) + vrow("b_sq", 2 * H)        # [self | query]
    x_r = sq[:, 0:H]
    q = sq[:, H:2 * H]

    # ---- per-edge path: (E, .) with E = k_deg * n_dst rows, k-major edge order ----
    h_se = dot(x_src_e_ref[...], wmat("emb_src_w", in_src)) + vrow("emb_src_b")
    xs_e = _layer_norm(h_se, vrow("ln_src_g"), vrow("ln_src_b"))
    kv_e = dot(xs_e, wmat("w_kv", H, 2 * H)) + vrow("b_kv", 2 * H)    # [key | value]
    e_emb = dot(e_attr_ref[...], wmat("w_e", edge_dim)) + vrow("b_e")
    k_e = kv_e[:, 0:H] + e_emb
    v_e = kv_e[:, H:2 * H] + e_emb

    # ---- multi-head attention: exact per-destination softmax over the K incident edges ----
    head_sum = _group_onehot(H, heads, head_dim)                      # (H, nh)  MXU reduce
    head_bcast = _group_onehot(H, heads, head_dim, transpose=True)    # (nh, H)  MXU bcast
    scale = 1.0 / math.sqrt(head_dim)

    logits = []
    vals = []
    for k in range(k_deg):                                            # static K-step unroll
        sl = slice(k * n_dst, (k + 1) * n_dst)
        logits.append(dot(q * k_e[sl, :], head_sum) * scale)          # (n_dst, nh)
        vals.append(v_e[sl, :])                                       # (n_dst, H)

    m = logits[0]
    for k in range(1, k_deg):
        m = jnp.maximum(m, logits[k])                                 # per-dst, per-head max

    denom = None
    num = None
    for k in range(k_deg):
        p_k = jnp.exp(logits[k] - m)
        w_k = dot(p_k, head_bcast) * vals[k]
        denom = p_k if denom is None else denom + p_k
        num = w_k if num is None else num + w_k
    attn = num * dot(pl.reciprocal(denom, approx=True), head_bcast)   # (n_dst, H)

    # ---- output projection + residual, then dst-node MLP + residual (128-wide store) ----
    out = dot(attn + x_r, wmat("w_proj", H, 128)) + vrow("b_proj", 128) + h_dst
    hm = _layer_norm(out[:, 0:H], vrow("ln_mlp_g"), vrow("ln_mlp_b"))
    hm = dot(hm, wmat("w_mlp1", H, mlp_hidden)) + vrow("b_mlp1", mlp_hidden)
    hm = _gelu(hm)
    res = dot(hm, wmat("w_mlp2", mlp_hidden, 128)) + vrow("b_mlp2", 128)

    o_ref[...] = (res + out).astype(o_ref.dtype)                      # lane-dense (n_dst,128)


# ------------------------------ model definition ------------------------------

CFG = dict(
    in_channels_src=6,
    in_channels_dst=4,
    hidden_dim=32,
    num_heads=4,            # head_dim = 8
    mlp_hidden_ratio=2,     # mlp hidden = 64
    trainable_size=3,
    edge_attr_dim=2,        # edge_dim = 2 + 3 = 5
    src_grid_size=16,
    dst_grid_size=8,
    k_in_degree=4,          # fixed in-degree per dst node -> 32 base edges
    batch_size=2,
)


def init_params(key, cfg):
    """Deterministic synthetic parameters (shapes match the torch module)."""
    H = cfg["hidden_dim"]
    mlp_h = cfg["mlp_hidden_ratio"] * H
    edge_dim = cfg["edge_attr_dim"] + cfg["trainable_size"]

    def lin(k, cin, cout, scale=0.1):
        kw, kb = jax.random.split(k)
        return (scale * jax.random.normal(kw, (cin, cout), jnp.float32),
                scale * jax.random.normal(kb, (cout,), jnp.float32))

    keys = jax.random.split(key, 16)
    p = {}
    p["emb_src_w"], p["emb_src_b"] = lin(keys[0], cfg["in_channels_src"], H)
    p["emb_dst_w"], p["emb_dst_b"] = lin(keys[1], cfg["in_channels_dst"], H)
    p["ln_src_g"] = 1.0 + 0.05 * jax.random.normal(keys[2], (H,), jnp.float32)
    p["ln_src_b"] = 0.05 * jax.random.normal(keys[3], (H,), jnp.float32)
    p["ln_dst_g"] = 1.0 + 0.05 * jax.random.normal(keys[4], (H,), jnp.float32)
    p["ln_dst_b"] = 0.05 * jax.random.normal(keys[5], (H,), jnp.float32)
    p["w_self"], p["b_self"] = lin(keys[6], H, H)
    p["w_q"], p["b_q"] = lin(keys[7], H, H)
    p["w_k"], p["b_k"] = lin(keys[8], H, H)
    p["w_v"], p["b_v"] = lin(keys[9], H, H)
    p["w_e"], p["b_e"] = lin(keys[10], edge_dim, H)
    p["w_proj"], p["b_proj"] = lin(keys[11], H, H)
    p["ln_mlp_g"] = 1.0 + 0.05 * jax.random.normal(keys[12], (H,), jnp.float32)
    p["ln_mlp_b"] = 0.05 * jax.random.normal(keys[13], (H,), jnp.float32)
    p["w_mlp1"], p["b_mlp1"] = lin(keys[14], H, mlp_h)
    p["w_mlp2"], p["b_mlp2"] = lin(keys[15], mlp_h, H)
    return p


def graph_transformer_forward_mapper(x_src, x_dst, edge_attr_base, trainable_edge,
                                     edge_src_base, edge_dst_base, packed_params, cfg):
    """Pallas-backed forward of GraphTransformerForwardMapper (data -> hidden).

    edge_src_base / edge_dst_base are host-side (numpy) graph structure; the kernel relies
    on edges sorted by destination with a fixed in-degree K, which is validated here.
    """
    H = cfg["hidden_dim"]
    nh = cfg["num_heads"]
    hd = H // nh
    mlp_h = cfg["mlp_hidden_ratio"] * H
    B = cfg["batch_size"]
    K = cfg["k_in_degree"]
    in_src = cfg["in_channels_src"]
    in_dst = cfg["in_channels_dst"]
    edge_dim = cfg["edge_attr_dim"] + cfg["trainable_size"]
    n_dst = x_dst.shape[0]

    # --- host-side graph structure prep (numpy; constant under jit) ---
    edge_src = np.asarray(edge_src_base)
    edge_dst = np.asarray(edge_dst_base)
    src_idx = np.concatenate([edge_src + b * cfg["src_grid_size"] for b in range(B)]).astype(np.int32)
    dst_idx = np.concatenate([edge_dst + b * cfg["dst_grid_size"] for b in range(B)]).astype(np.int32)
    n_edges = src_idx.shape[0]
    if not np.array_equal(dst_idx, np.repeat(np.arange(n_dst, dtype=np.int32), K)):
        raise ValueError("kernel requires edges sorted by destination with a fixed in-degree K")
    # k-major permutation: new row (k * n_dst + d) <- old edge (d * K + k)
    order = (np.arange(n_dst, dtype=np.int32)[None, :] * K
             + np.arange(K, dtype=np.int32)[:, None]).reshape(-1)
    src_idx_km = src_idx[order]

    # --- TrainableTensor + _expand_edges + row gather: cheap data-prep glue ---
    edge_attr = jnp.concatenate(
        [jnp.tile(edge_attr_base, (B, 1)), jnp.tile(trainable_edge, (B, 1))], axis=-1)
    edge_attr_km = jnp.take(edge_attr, jnp.asarray(order), axis=0)        # (E, edge_dim)
    # The per-node embedding/LN/[k|v] projection commute with a row gather, so gather the
    # raw src features per edge here and let the kernel work purely per edge.
    x_src_edges = jnp.take(x_src, jnp.asarray(src_idx_km), axis=0)        # (E, in_src)

    lay, slab_rows = _param_layout(cfg)
    assert packed_params.shape == (slab_rows, 128)

    kern = functools.partial(
        _fused_mapper_kernel,
        lay=lay, n_dst=n_dst, k_deg=K, in_src=in_src, in_dst=in_dst, edge_dim=edge_dim,
        hidden=H, mlp_hidden=mlp_h, heads=nh, head_dim=hd)

    E = n_edges
    flops = 2 * (n_dst * in_dst * 128 + n_dst * H * 2 * H
                 + E * in_src * H + E * H * 2 * H + E * edge_dim * H
                 + E * H * nh + E * nh * H
                 + n_dst * H * 128 + n_dst * H * mlp_h + n_dst * mlp_h * 128)
    transcendentals = E * nh + 2 * n_dst * mlp_h
    bytes_accessed = 4 * (x_dst.size + E * in_src + E * edge_dim
                          + packed_params.size + n_dst * 128)

    # One launch, whole (tiny) problem resident in VMEM; 4 operands, lane-dense output.
    out128 = pl.pallas_call(
        kern,
        out_shape=jax.ShapeDtypeStruct((n_dst, 128), jnp.float32),
        cost_estimate=pl.CostEstimate(flops=flops, transcendentals=transcendentals,
                                      bytes_accessed=bytes_accessed),
    )(x_dst, x_src_edges, edge_attr_km, packed_params)

    # GraphTransformerForwardMapper.forward returns (original x_src, updated x_dst).
    return x_src, out128[:, :H]


# -------------------------- pure-JAX reference (check) ---------------------

def reference_forward(x_src, x_dst, edge_attr_base, trainable_edge,
                      edge_src_base, edge_dst_base, params, cfg):
    H = cfg["hidden_dim"]
    nh = cfg["num_heads"]
    hd = H // nh
    B = cfg["batch_size"]
    n_dst = x_dst.shape[0]

    def lin(x, w, b):
        return jnp.dot(x, w, precision=jax.lax.Precision.HIGHEST) + b

    def ln(x, g, b):
        mu = x.mean(-1, keepdims=True)
        var = ((x - mu) ** 2).mean(-1, keepdims=True)
        return (x - mu) / jnp.sqrt(var + 1e-5) * g + b

    edge_attr = jnp.concatenate(
        [jnp.tile(edge_attr_base, (B, 1)), jnp.tile(trainable_edge, (B, 1))], axis=-1)
    src_idx = np.concatenate([np.asarray(edge_src_base) + b * cfg["src_grid_size"]
                              for b in range(B)]).astype(np.int32)
    dst_idx = np.concatenate([np.asarray(edge_dst_base) + b * cfg["dst_grid_size"]
                              for b in range(B)]).astype(np.int32)

    h_src = lin(x_src, params["emb_src_w"], params["emb_src_b"])
    h_dst = lin(x_dst, params["emb_dst_w"], params["emb_dst_b"])
    x_skip_dst = h_dst
    xs = ln(h_src, params["ln_src_g"], params["ln_src_b"])
    xd = ln(h_dst, params["ln_dst_g"], params["ln_dst_b"])
    x_r = lin(xd, params["w_self"], params["b_self"])
    q = lin(xd, params["w_q"], params["b_q"])
    k = lin(xs, params["w_k"], params["b_k"])
    v = lin(xs, params["w_v"], params["b_v"])
    e = lin(edge_attr, params["w_e"], params["b_e"])

    q_e = jnp.take(q, dst_idx, axis=0).reshape(-1, nh, hd)
    k_e = jnp.take(k, src_idx, axis=0).reshape(-1, nh, hd) + e.reshape(-1, nh, hd)
    v_e = jnp.take(v, src_idx, axis=0).reshape(-1, nh, hd) + e.reshape(-1, nh, hd)
    logits = (q_e * k_e).sum(-1) / math.sqrt(hd)                         # (E, heads)
    lmax = jax.ops.segment_max(logits, dst_idx, num_segments=n_dst)
    p = jnp.exp(logits - lmax[dst_idx])
    denom = jax.ops.segment_sum(p, dst_idx, num_segments=n_dst)
    p = p / denom[dst_idx]
    attn = jax.ops.segment_sum(p[:, :, None] * v_e, dst_idx, num_segments=n_dst)
    attn = attn.reshape(n_dst, H)

    out = lin(attn + x_r, params["w_proj"], params["b_proj"])
    out = out + x_skip_dst
    hm = ln(out, params["ln_mlp_g"], params["ln_mlp_b"])
    hm = lin(hm, params["w_mlp1"], params["b_mlp1"])
    hm = jax.nn.gelu(hm, approximate=False)
    hm = lin(hm, params["w_mlp2"], params["b_mlp2"])
    return x_src, hm + out


# --------------------------------- main -------------------------------------

if __name__ == "__main__":
    cfg = CFG
    key = jax.random.PRNGKey(0)
    k_param, k_xsrc, k_xdst, k_eattr, k_train, k_edges = jax.random.split(key, 6)

    B = cfg["batch_size"]
    n_src = B * cfg["src_grid_size"]
    n_dst = B * cfg["dst_grid_size"]
    e0 = cfg["dst_grid_size"] * cfg["k_in_degree"]

    params = init_params(k_param, cfg)
    x_src = jax.random.normal(k_xsrc, (n_src, cfg["in_channels_src"]), jnp.float32)
    x_dst = jax.random.normal(k_xdst, (n_dst, cfg["in_channels_dst"]), jnp.float32)
    edge_attr_base = jax.random.normal(k_eattr, (e0, cfg["edge_attr_dim"]), jnp.float32)
    trainable_edge = 0.1 * jax.random.normal(k_train, (e0, cfg["trainable_size"]), jnp.float32)

    # Bipartite graph with fixed in-degree K per destination node (edges sorted by dst).
    edge_dst_base = np.repeat(np.arange(cfg["dst_grid_size"], dtype=np.int32),
                              cfg["k_in_degree"])
    edge_src_base = np.asarray(
        jax.random.randint(k_edges, (e0,), 0, cfg["src_grid_size"], dtype=jnp.int32))

    # One-time host-side parameter packing into the single lane-dense (rows, 128) slab.
    packed_params = pack_mapper_params(params, cfg)

    @jax.jit
    def run(x_src_, x_dst_, edge_attr_base_, trainable_edge_, packed_params_):
        return graph_transformer_forward_mapper(
            x_src_, x_dst_, edge_attr_base_, trainable_edge_,
            edge_src_base, edge_dst_base, packed_params_, cfg)

    x_src_out, x_dst_out = run(x_src, x_dst, edge_attr_base, trainable_edge, packed_params)
    jax.block_until_ready(x_dst_out)

    # Correctness check against the pure-JAX reference of the torch semantics.
    _, ref_dst = reference_forward(x_src, x_dst, edge_attr_base, trainable_edge,
                                   edge_src_base, edge_dst_base, params, cfg)
    assert x_dst_out.shape == (n_dst, cfg["hidden_dim"])
    assert x_src_out.shape == x_src.shape
    # Kernel matmuls run at default MXU precision (bf16-class) and the softmax denominator
    # uses the approximate EUP reciprocal, while the reference uses HIGHEST precision,
    # hence the relaxed tolerance.
    assert jnp.allclose(x_dst_out, ref_dst, atol=2e-2, rtol=2e-2), "mismatch vs reference"

    print("KERNEL_OK")
</pallas_src>

<mosaic_0001>
module attributes {stable_mosaic.version = 11 : i64} {
  func.func @_fused_mapper_kernel(%arg0: memref<16x4xf32, #tpu.memory_space<vmem>>, %arg1: memref<64x6xf32, #tpu.memory_space<vmem>>, %arg2: memref<64x5xf32, #tpu.memory_space<vmem>>, %arg3: memref<232x128xf32, #tpu.memory_space<vmem>>, %arg4: memref<16x128xf32, #tpu.memory_space<vmem>>) attributes {dimension_semantics = [], scalar_prefetch = 0 : i64, scratch_operands = 0 : i64, tpu.core_type = #tpu.core_type<tc>} {
    %c0 = arith.constant 0 : index
    %c0_0 = arith.constant 0 : index
    %0 = vector.load %arg0[%c0, %c0_0] : memref<16x4xf32, #tpu.memory_space<vmem>>, vector<16x4xf32>
    %c8 = arith.constant 8 : index
    %c0_1 = arith.constant 0 : index
    %1 = vector.load %arg3[%c8, %c0_1] : memref<232x128xf32, #tpu.memory_space<vmem>>, vector<4x128xf32>
    %cst = arith.constant dense<0.000000e+00> : vector<16x128xf32>
    %2 = tpu.matmul %0, %1, %cst {dimension_numbers = #tpu.dot_dimension_numbers<[1], [0], [0], [1], [0, 0, 1, 1], [], []>} : vector<16x4xf32>, vector<4x128xf32>, vector<16x128xf32> -> vector<16x128xf32>
    %c217 = arith.constant 217 : index
    %c0_2 = arith.constant 0 : index
    %3 = vector.load %arg3[%c217, %c0_2] : memref<232x128xf32, #tpu.memory_space<vmem>>, vector<1x128xf32>
    %4 = vector.broadcast %3 : vector<1x128xf32> to vector<16x128xf32>
    %5 = arith.addf %2, %4 : vector<16x128xf32>
    %6 = vector.extract_strided_slice %5 {offsets = [0, 0], sizes = [16, 32], strides = [1, 1]} : vector<16x128xf32> to vector<16x32xf32>
    %c220 = arith.constant 220 : index
    %c0_3 = arith.constant 0 : index
    %7 = vector.load %arg3[%c220, %c0_3] : memref<232x128xf32, #tpu.memory_space<vmem>>, vector<1x32xf32>
    %c221 = arith.constant 221 : index
    %c0_4 = arith.constant 0 : index
    %8 = vector.load %arg3[%c221, %c0_4] : memref<232x128xf32, #tpu.memory_space<vmem>>, vector<1x32xf32>
    %cst_5 = arith.constant dense<0.000000e+00> : vector<16xf32>
    %9 = vector.multi_reduction <add>, %6, %cst_5 [1] : vector<16x32xf32> to vector<16xf32>
    %10 = vector.shape_cast %9 : vector<16xf32> to vector<16x1xf32>
    %cst_6 = arith.constant 3.200000e+01 : f32
    %11 = vector.broadcast %cst_6 : f32 to vector<16x1xf32>
    %12 = arith.divf %10, %11 : vector<16x1xf32>
    %13 = vector.broadcast %12 : vector<16x1xf32> to vector<16x32xf32>
    %14 = arith.subf %6, %13 : vector<16x32xf32>
    %15 = arith.mulf %14, %14 : vector<16x32xf32>
    %cst_7 = arith.constant dense<0.000000e+00> : vector<16xf32>
    %16 = vector.multi_reduction <add>, %15, %cst_7 [1] : vector<16x32xf32> to vector<16xf32>
    %17 = vector.shape_cast %16 : vector<16xf32> to vector<16x1xf32>
    %cst_8 = arith.constant 3.200000e+01 : f32
    %18 = vector.broadcast %cst_8 : f32 to vector<16x1xf32>
    %19 = arith.divf %17, %18 : vector<16x1xf32>
    %cst_9 = arith.constant 9.99999974E-6 : f32
    %20 = vector.broadcast %cst_9 : f32 to vector<16x1xf32>
    %21 = arith.addf %19, %20 : vector<16x1xf32>
    %22 = math.rsqrt %21 : vector<16x1xf32>
    %23 = vector.broadcast %22 : vector<16x1xf32> to vector<16x32xf32>
    %24 = arith.mulf %14, %23 : vector<16x32xf32>
    %25 = vector.broadcast %7 : vector<1x32xf32> to vector<16x32xf32>
    %26 = arith.mulf %24, %25 : vector<16x32xf32>
    %27 = vector.broadcast %8 : vector<1x32xf32> to vector<16x32xf32>
    %28 = arith.addf %26, %27 : vector<16x32xf32>
    %c24 = arith.constant 24 : index
    %c0_10 = arith.constant 0 : index
    %29 = vector.load %arg3[%c24, %c0_10] : memref<232x128xf32, #tpu.memory_space<vmem>>, vector<32x64xf32>
    %cst_11 = arith.constant dense<0.000000e+00> : vector<16x64xf32>
    %30 = tpu.matmul %28, %29, %cst_11 {dimension_numbers = #tpu.dot_dimension_numbers<[1], [0], [0], [1], [0, 0, 1, 1], [], []>} : vector<16x32xf32>, vector<32x64xf32>, vector<16x64xf32> -> vector<16x64xf32>
    %c222 = arith.constant 222 : index
    %c0_12 = arith.constant 0 : index
    %31 = vector.load %arg3[%c222, %c0_12] : memref<232x128xf32, #tpu.memory_space<vmem>>, vector<1x64xf32>
    %32 = vector.broadcast %31 : vector<1x64xf32> to vector<16x64xf32>
    %33 = arith.addf %30, %32 : vector<16x64xf32>
    %34 = vector.extract_strided_slice %33 {offsets = [0, 0], sizes = [16, 32], strides = [1, 1]} : vector<16x64xf32> to vector<16x32xf32>
    %35 = vector.extract_strided_slice %33 {offsets = [0, 32], sizes = [16, 32], strides = [1, 1]} : vector<16x64xf32> to vector<16x32xf32>
    %c0_13 = arith.constant 0 : index
    %c0_14 = arith.constant 0 : index
    %36 = vector.load %arg1[%c0_13, %c0_14] : memref<64x6xf32, #tpu.memory_space<vmem>>, vector<64x6xf32>
    %c0_15 = arith.constant 0 : index
    %c0_16 = arith.constant 0 : index
    %37 = vector.load %arg3[%c0_15, %c0_16] : memref<232x128xf32, #tpu.memory_space<vmem>>, vector<6x32xf32>
    %cst_17 = arith.constant dense<0.000000e+00> : vector<64x32xf32>
    %38 = tpu.matmul %36, %37, %cst_17 {dimension_numbers = #tpu.dot_dimension_numbers<[1], [0], [0], [1], [0, 0, 1, 1], [], []>} : vector<64x6xf32>, vector<6x32xf32>, vector<64x32xf32> -> vector<64x32xf32>
    %c216 = arith.constant 216 : index
    %c0_18 = arith.constant 0 : index
    %39 = vector.load %arg3[%c216, %c0_18] : memref<232x128xf32, #tpu.memory_space<vmem>>, vector<1x32xf32>
    %40 = vector.broadcast %39 : vector<1x32xf32> to vector<64x32xf32>
    %41 = arith.addf %38, %40 : vector<64x32xf32>
    %c218 = arith.constant 218 : index
    %c0_19 = arith.constant 0 : index
    %42 = vector.load %arg3[%c218, %c0_19] : memref<232x128xf32, #tpu.memory_space<vmem>>, vector<1x32xf32>
    %c219 = arith.constant 219 : index
    %c0_20 = arith.constant 0 : index
    %43 = vector.load %arg3[%c219, %c0_20] : memref<232x128xf32, #tpu.memory_space<vmem>>, vector<1x32xf32>
    %cst_21 = arith.constant dense<0.000000e+00> : vector<64xf32>
    %44 = vector.multi_reduction <add>, %41, %cst_21 [1] : vector<64x32xf32> to vector<64xf32>
    %45 = vector.shape_cast %44 : vector<64xf32> to vector<64x1xf32>
    %cst_22 = arith.constant 3.200000e+01 : f32
    %46 = vector.broadcast %cst_22 : f32 to vector<64x1xf32>
    %47 = arith.divf %45, %46 : vector<64x1xf32>
    %48 = vector.broadcast %47 : vector<64x1xf32> to vector<64x32xf32>
    %49 = arith.subf %41, %48 : vector<64x32xf32>
    %50 = arith.mulf %49, %49 : vector<64x32xf32>
    %cst_23 = arith.constant dense<0.000000e+00> : vector<64xf32>
    %51 = vector.multi_reduction <add>, %50, %cst_23 [1] : vector<64x32xf32> to vector<64xf32>
    %52 = vector.shape_cast %51 : vector<64xf32> to vector<64x1xf32>
    %cst_24 = arith.constant 3.200000e+01 : f32
    %53 = vector.broadcast %cst_24 : f32 to vector<64x1xf32>
    %54 = arith.divf %52, %53 : vector<64x1xf32>
    %cst_25 = arith.constant 9.99999974E-6 : f32
    %55 = vector.broadcast %cst_25 : f32 to vector<64x1xf32>
    %56 = arith.addf %54, %55 : vector<64x1xf32>
    %57 = math.rsqrt %56 : vector<64x1xf32>
    %58 = vector.broadcast %57 : vector<64x1xf32> to vector<64x32xf32>
    %59 = arith.mulf %49, %58 : vector<64x32xf32>
    %60 = vector.broadcast %42 : vector<1x32xf32> to vector<64x32xf32>
    %61 = arith.mulf %59, %60 : vector<64x32xf32>
    %62 = vector.broadcast %43 : vector<1x32xf32> to vector<64x32xf32>
    %63 = arith.addf %61, %62 : vector<64x32xf32>
    %c56 = arith.constant 56 : index
    %c0_26 = arith.constant 0 : index
    %64 = vector.load %arg3[%c56, %c0_26] : memref<232x128xf32, #tpu.memory_space<vmem>>, vector<32x64xf32>
    %cst_27 = arith.constant dense<0.000000e+00> : vector<64x64xf32>
    %65 = tpu.matmul %63, %64, %cst_27 {dimension_numbers = #tpu.dot_dimension_numbers<[1], [0], [0], [1], [0, 0, 1, 1], [], []>} : vector<64x32xf32>, vector<32x64xf32>, vector<64x64xf32> -> vector<64x64xf32>
    %c223 = arith.constant 223 : index
    %c0_28 = arith.constant 0 : index
    %66 = vector.load %arg3[%c223, %c0_28] : memref<232x128xf32, #tpu.memory_space<vmem>>, vector<1x64xf32>
    %67 = vector.broadcast %66 : vector<1x64xf32> to vector<64x64xf32>
    %68 = arith.addf %65, %67 : vector<64x64xf32>
    %c0_29 = arith.constant 0 : index
    %c0_30 = arith.constant 0 : index
    %69 = vector.load %arg2[%c0_29, %c0_30] : memref<64x5xf32, #tpu.memory_space<vmem>>, vector<64x5xf32>
    %c16 = arith.constant 16 : index
    %c0_31 = arith.constant 0 : index
    %70 = vector.load %arg3[%c16, %c0_31] : memref<232x128xf32, #tpu.memory_space<vmem>>, vector<5x32xf32>
    %cst_32 = arith.constant dense<0.000000e+00> : vector<64x32xf32>
    %71 = tpu.matmul %69, %70, %cst_32 {dimension_numbers = #tpu.dot_dimension_numbers<[1], [0], [0], [1], [0, 0, 1, 1], [], []>} : vector<64x5xf32>, vector<5x32xf32>, vector<64x32xf32> -> vector<64x32xf32>
    %c224 = arith.constant 224 : index
    %c0_33 = arith.constant 0 : index
    %72 = vector.load %arg3[%c224, %c0_33] : memref<232x128xf32, #tpu.memory_space<vmem>>, vector<1x32xf32>
    %73 = vector.broadcast %72 : vector<1x32xf32> to vector<64x32xf32>
    %74 = arith.addf %71, %73 : vector<64x32xf32>
    %75 = vector.extract_strided_slice %68 {offsets = [0, 0], sizes = [64, 32], strides = [1, 1]} : vector<64x64xf32> to vector<64x32xf32>
    %76 = arith.addf %75, %74 : vector<64x32xf32>
    %77 = vector.extract_strided_slice %68 {offsets = [0, 32], sizes = [64, 32], strides = [1, 1]} : vector<64x64xf32> to vector<64x32xf32>
    %78 = arith.addf %77, %74 : vector<64x32xf32>
    %79 = tpu.iota {dimensions = array<i32: 0>} : vector<32x4xi32>
    %80 = tpu.iota {dimensions = array<i32: 1>} : vector<32x4xi32>
    %c8_i32 = arith.constant 8 : i32
    %81 = vector.broadcast %c8_i32 : i32 to vector<32x4xi32>
    %82 = arith.muli %80, %81 : vector<32x4xi32>
    %83 = arith.cmpi sge, %79, %82 : vector<32x4xi32>
    %c1_i32 = arith.constant 1 : i32
    %84 = vector.broadcast %c1_i32 : i32 to vector<32x4xi32>
    %85 = arith.addi %80, %84 : vector<32x4xi32>
    %c8_i32_34 = arith.constant 8 : i32
    %86 = vector.broadcast %c8_i32_34 : i32 to vector<32x4xi32>
    %87 = arith.muli %85, %86 : vector<32x4xi32>
    %88 = arith.cmpi slt, %79, %87 : vector<32x4xi32>
    %89 = arith.andi %83, %88 : vector<32x4xi1>
    %90 = arith.extui %89 : vector<32x4xi1> to vector<32x4xi32>
    %91 = arith.sitofp %90 : vector<32x4xi32> to vector<32x4xf32>
    %92 = tpu.iota {dimensions = array<i32: 1>} : vector<4x32xi32>
    %93 = tpu.iota {dimensions = array<i32: 0>} : vector<4x32xi32>
    %c8_i32_35 = arith.constant 8 : i32
    %94 = vector.broadcast %c8_i32_35 : i32 to vector<4x32xi32>
    %95 = arith.muli %93, %94 : vector<4x32xi32>
    %96 = arith.cmpi sge, %92, %95 : vector<4x32xi32>
    %c1_i32_36 = arith.constant 1 : i32
    %97 = vector.broadcast %c1_i32_36 : i32 to vector<4x32xi32>
    %98 = arith.addi %93, %97 : vector<4x32xi32>
    %c8_i32_37 = arith.constant 8 : i32
    %99 = vector.broadcast %c8_i32_37 : i32 to vector<4x32xi32>
    %100 = arith.muli %98, %99 : vector<4x32xi32>
    %101 = arith.cmpi slt, %92, %100 : vector<4x32xi32>
    %102 = arith.andi %96, %101 : vector<4x32xi1>
    %103 = arith.extui %102 : vector<4x32xi1> to vector<4x32xi32>
    %104 = arith.sitofp %103 : vector<4x32xi32> to vector<4x32xf32>
    %105 = vector.extract_strided_slice %76 {offsets = [0, 0], sizes = [16, 32], strides = [1, 1]} : vector<64x32xf32> to vector<16x32xf32>
    %106 = arith.mulf %35, %105 : vector<16x32xf32>
    %cst_38 = arith.constant dense<0.000000e+00> : vector<16x4xf32>
    %107 = tpu.matmul %106, %91, %cst_38 {dimension_numbers = #tpu.dot_dimension_numbers<[1], [0], [0], [1], [0, 0, 1, 1], [], []>} : vector<16x32xf32>, vector<32x4xf32>, vector<16x4xf32> -> vector<16x4xf32>
    %cst_39 = arith.constant 0.353553385 : f32
    %108 = vector.broadcast %cst_39 : f32 to vector<16x4xf32>
    %109 = arith.mulf %107, %108 : vector<16x4xf32>
    %110 = vector.extract_strided_slice %78 {offsets = [0, 0], sizes = [16, 32], strides = [1, 1]} : vector<64x32xf32> to vector<16x32xf32>
    %111 = vector.extract_strided_slice %76 {offsets = [16, 0], sizes = [16, 32], strides = [1, 1]} : vector<64x32xf32> to vector<16x32xf32>
    %112 = arith.mulf %35, %111 : vector<16x32xf32>
    %cst_40 = arith.constant dense<0.000000e+00> : vector<16x4xf32>
    %113 = tpu.matmul %112, %91, %cst_40 {dimension_numbers = #tpu.dot_dimension_numbers<[1], [0], [0], [1], [0, 0, 1, 1], [], []>} : vector<16x32xf32>, vector<32x4xf32>, vector<16x4xf32> -> vector<16x4xf32>
    %cst_41 = arith.constant 0.353553385 : f32
    %114 = vector.broadcast %cst_41 : f32 to vector<16x4xf32>
    %115 = arith.mulf %113, %114 : vector<16x4xf32>
    %116 = vector.extract_strided_slice %78 {offsets = [16, 0], sizes = [16, 32], strides = [1, 1]} : vector<64x32xf32> to vector<16x32xf32>
    %117 = vector.extract_strided_slice %76 {offsets = [32, 0], sizes = [16, 32], strides = [1, 1]} : vector<64x32xf32> to vector<16x32xf32>
    %118 = arith.mulf %35, %117 : vector<16x32xf32>
    %cst_42 = arith.constant dense<0.000000e+00> : vector<16x4xf32>
    %119 = tpu.matmul %118, %91, %cst_42 {dimension_numbers = #tpu.dot_dimension_numbers<[1], [0], [0], [1], [0, 0, 1, 1], [], []>} : vector<16x32xf32>, vector<32x4xf32>, vector<16x4xf32> -> vector<16x4xf32>
    %cst_43 = arith.constant 0.353553385 : f32
    %120 = vector.broadcast %cst_43 : f32 to vector<16x4xf32>
    %121 = arith.mulf %119, %120 : vector<16x4xf32>
    %122 = vector.extract_strided_slice %78 {offsets = [32, 0], sizes = [16, 32], strides = [1, 1]} : vector<64x32xf32> to vector<16x32xf32>
    %123 = vector.extract_strided_slice %76 {offsets = [48, 0], sizes = [16, 32], strides = [1, 1]} : vector<64x32xf32> to vector<16x32xf32>
    %124 = arith.mulf %35, %123 : vector<16x32xf32>
    %cst_44 = arith.constant dense<0.000000e+00> : vector<16x4xf32>
    %125 = tpu.matmul %124, %91, %cst_44 {dimension_numbers = #tpu.dot_dimension_numbers<[1], [0], [0], [1], [0, 0, 1, 1], [], []>} : vector<16x32xf32>, vector<32x4xf32>, vector<16x4xf32> -> vector<16x4xf32>
    %cst_45 = arith.constant 0.353553385 : f32
    %126 = vector.broadcast %cst_45 : f32 to vector<16x4xf32>
    %127 = arith.mulf %125, %126 : vector<16x4xf32>
    %128 = vector.extract_strided_slice %78 {offsets = [48, 0], sizes = [16, 32], strides = [1, 1]} : vector<64x32xf32> to vector<16x32xf32>
    %129 = arith.maximumf %109, %115 : vector<16x4xf32>
    %130 = arith.maximumf %129, %121 : vector<16x4xf32>
    %131 = arith.maximumf %130, %127 : vector<16x4xf32>
    %132 = arith.subf %109, %131 : vector<16x4xf32>
    %133 = math.exp %132 : vector<16x4xf32>
    %cst_46 = arith.constant dense<0.000000e+00> : vector<16x32xf32>
    %134 = tpu.matmul %133, %104, %cst_46 {dimension_numbers = #tpu.dot_dimension_numbers<[1], [0], [0], [1], [0, 0, 1, 1], [], []>} : vector<16x4xf32>, vector<4x32xf32>, vector<16x32xf32> -> vector<16x32xf32>
    %135 = arith.mulf %134, %110 : vector<16x32xf32>
    %136 = arith.subf %115, %131 : vector<16x4xf32>
    %137 = math.exp %136 : vector<16x4xf32>
    %cst_47 = arith.constant dense<0.000000e+00> : vector<16x32xf32>
    %138 = tpu.matmul %137, %104, %cst_47 {dimension_numbers = #tpu.dot_dimension_numbers<[1], [0], [0], [1], [0, 0, 1, 1], [], []>} : vector<16x4xf32>, vector<4x32xf32>, vector<16x32xf32> -> vector<16x32xf32>
    %139 = arith.mulf %138, %116 : vector<16x32xf32>
    %140 = arith.addf %133, %137 : vector<16x4xf32>
    %141 = arith.addf %135, %139 : vector<16x32xf32>
    %142 = arith.subf %121, %131 : vector<16x4xf32>
    %143 = math.exp %142 : vector<16x4xf32>
    %cst_48 = arith.constant dense<0.000000e+00> : vector<16x32xf32>
    %144 = tpu.matmul %143, %104, %cst_48 {dimension_numbers = #tpu.dot_dimension_numbers<[1], [0], [0], [1], [0, 0, 1, 1], [], []>} : vector<16x4xf32>, vector<4x32xf32>, vector<16x32xf32> -> vector<16x32xf32>
    %145 = arith.mulf %144, %122 : vector<16x32xf32>
    %146 = arith.addf %140, %143 : vector<16x4xf32>
    %147 = arith.addf %141, %145 : vector<16x32xf32>
    %148 = arith.subf %127, %131 : vector<16x4xf32>
    %149 = math.exp %148 : vector<16x4xf32>
    %cst_49 = arith.constant dense<0.000000e+00> : vector<16x32xf32>
    %150 = tpu.matmul %149, %104, %cst_49 {dimension_numbers = #tpu.dot_dimension_numbers<[1], [0], [0], [1], [0, 0, 1, 1], [], []>} : vector<16x4xf32>, vector<4x32xf32>, vector<16x32xf32> -> vector<16x32xf32>
    %151 = arith.mulf %150, %128 : vector<16x32xf32>
    %152 = arith.addf %146, %149 : vector<16x4xf32>
    %153 = arith.addf %147, %151 : vector<16x32xf32>
    %154 = tpu.reciprocal %152 {approx = true} : vector<16x4xf32> -> vector<16x4xf32>
    %cst_50 = arith.constant dense<0.000000e+00> : vector<16x32xf32>
    %155 = tpu.matmul %154, %104, %cst_50 {dimension_numbers = #tpu.dot_dimension_numbers<[1], [0], [0], [1], [0, 0, 1, 1], [], []>} : vector<16x4xf32>, vector<4x32xf32>, vector<16x32xf32> -> vector<16x32xf32>
    %156 = arith.mulf %153, %155 : vector<16x32xf32>
    %157 = arith.addf %156, %34 : vector<16x32xf32>
    %c88 = arith.constant 88 : index
    %c0_51 = arith.constant 0 : index
    %158 = vector.load %arg3[%c88, %c0_51] : memref<232x128xf32, #tpu.memory_space<vmem>>, vector<32x128xf32>
    %cst_52 = arith.constant dense<0.000000e+00> : vector<16x128xf32>
    %159 = tpu.matmul %157, %158, %cst_52 {dimension_numbers = #tpu.dot_dimension_numbers<[1], [0], [0], [1], [0, 0, 1, 1], [], []>} : vector<16x32xf32>, vector<32x128xf32>, vector<16x128xf32> -> vector<16x128xf32>
    %c225 = arith.constant 225 : index
    %c0_53 = arith.constant 0 : index
    %160 = vector.load %arg3[%c225, %c0_53] : memref<232x128xf32, #tpu.memory_space<vmem>>, vector<1x128xf32>
    %161 = vector.broadcast %160 : vector<1x128xf32> to vector<16x128xf32>
    %162 = arith.addf %159, %161 : vector<16x128xf32>
    %163 = arith.addf %162, %5 : vector<16x128xf32>
    %164 = vector.extract_strided_slice %163 {offsets = [0, 0], sizes = [16, 32], strides = [1, 1]} : vector<16x128xf32> to vector<16x32xf32>
    %c226 = arith.constant 226 : index
    %c0_54 = arith.constant 0 : index
    %165 = vector.load %arg3[%c226, %c0_54] : memref<232x128xf32, #tpu.memory_space<vmem>>, vector<1x32xf32>
    %c227 = arith.constant 227 : index
    %c0_55 = arith.constant 0 : index
    %166 = vector.load %arg3[%c227, %c0_55] : memref<232x128xf32, #tpu.memory_space<vmem>>, vector<1x32xf32>
    %cst_56 = arith.constant dense<0.000000e+00> : vector<16xf32>
    %167 = vector.multi_reduction <add>, %164, %cst_56 [1] : vector<16x32xf32> to vector<16xf32>
    %168 = vector.shape_cast %167 : vector<16xf32> to vector<16x1xf32>
    %cst_57 = arith.constant 3.200000e+01 : f32
    %169 = vector.broadcast %cst_57 : f32 to vector<16x1xf32>
    %170 = arith.divf %168, %169 : vector<16x1xf32>
    %171 = vector.broadcast %170 : vector<16x1xf32> to vector<16x32xf32>
    %172 = arith.subf %164, %171 : vector<16x32xf32>
    %173 = arith.mulf %172, %172 : vector<16x32xf32>
    %cst_58 = arith.constant dense<0.000000e+00> : vector<16xf32>
    %174 = vector.multi_reduction <add>, %173, %cst_58 [1] : vector<16x32xf32> to vector<16xf32>
    %175 = vector.shape_cast %174 : vector<16xf32> to vector<16x1xf32>
    %cst_59 = arith.constant 3.200000e+01 : f32
    %176 = vector.broadcast %cst_59 : f32 to vector<16x1xf32>
    %177 = arith.divf %175, %176 : vector<16x1xf32>
    %cst_60 = arith.constant 9.99999974E-6 : f32
    %178 = vector.broadcast %cst_60 : f32 to vector<16x1xf32>
    %179 = arith.addf %177, %178 : vector<16x1xf32>
    %180 = math.rsqrt %179 : vector<16x1xf32>
    %181 = vector.broadcast %180 : vector<16x1xf32> to vector<16x32xf32>
    %182 = arith.mulf %172, %181 : vector<16x32xf32>
    %183 = vector.broadcast %165 : vector<1x32xf32> to vector<16x32xf32>
    %184 = arith.mulf %182, %183 : vector<16x32xf32>
    %185 = vector.broadcast %166 : vector<1x32xf32> to vector<16x32xf32>
    %186 = arith.addf %184, %185 : vector<16x32xf32>
    %c120 = arith.constant 120 : index
    %c0_61 = arith.constant 0 : index
    %187 = vector.load %arg3[%c120, %c0_61] : memref<232x128xf32, #tpu.memory_space<vmem>>, vector<32x64xf32>
    %cst_62 = arith.constant dense<0.000000e+00> : vector<16x64xf32>
    %188 = tpu.matmul %186, %187, %cst_62 {dimension_numbers = #tpu.dot_dimension_numbers<[1], [0], [0], [1], [0, 0, 1, 1], [], []>} : vector<16x32xf32>, vector<32x64xf32>, vector<16x64xf32> -> vector<16x64xf32>
    %c228 = arith.constant 228 : index
    %c0_63 = arith.constant 0 : index
    %189 = vector.load %arg3[%c228, %c0_63] : memref<232x128xf32, #tpu.memory_space<vmem>>, vector<1x64xf32>
    %190 = vector.broadcast %189 : vector<1x64xf32> to vector<16x64xf32>
    %191 = arith.addf %188, %190 : vector<16x64xf32>
    %cst_64 = arith.constant 5.000000e-01 : f32
    %192 = vector.broadcast %cst_64 : f32 to vector<16x64xf32>
    %193 = arith.mulf %192, %191 : vector<16x64xf32>
    %cst_65 = arith.constant 0.707106769 : f32
    %194 = vector.broadcast %cst_65 : f32 to vector<16x64xf32>
    %195 = arith.mulf %191, %194 : vector<16x64xf32>
    %cst_66 = arith.constant 0.000000e+00 : f32
    %196 = vector.broadcast %cst_66 : f32 to vector<16x64xf32>
    %197 = arith.cmpf oge, %195, %196 : vector<16x64xf32>
    %cst_67 = arith.constant 1.000000e+00 : f32
    %cst_68 = arith.constant -1.000000e+00 : f32
    %198 = vector.broadcast %cst_67 : f32 to vector<16x64xf32>
    %199 = vector.broadcast %cst_68 : f32 to vector<16x64xf32>
    %200 = arith.select %197, %198, %199 : vector<16x64xi1>, vector<16x64xf32>
    %201 = math.absf %195 : vector<16x64xf32>
    %cst_69 = arith.constant 0.327591091 : f32
    %202 = vector.broadcast %cst_69 : f32 to vector<16x64xf32>
    %203 = arith.mulf %202, %201 : vector<16x64xf32>
    %cst_70 = arith.constant 1.000000e+00 : f32
    %204 = vector.broadcast %cst_70 : f32 to vector<16x64xf32>
    %205 = arith.addf %204, %203 : vector<16x64xf32>
    %cst_71 = arith.constant 1.000000e+00 : f32
    %206 = vector.broadcast %cst_71 : f32 to vector<16x64xf32>
    %207 = arith.divf %206, %205 : vector<16x64xf32>
    %cst_72 = arith.constant 1.06140542 : f32
    %208 = vector.broadcast %cst_72 : f32 to vector<16x64xf32>
    %209 = arith.mulf %208, %207 : vector<16x64xf32>
    %cst_73 = arith.constant -1.45315206 : f32
    %210 = vector.broadcast %cst_73 : f32 to vector<16x64xf32>
    %211 = arith.addf %209, %210 : vector<16x64xf32>
    %212 = arith.mulf %211, %207 : vector<16x64xf32>
    %cst_74 = arith.constant 1.42141378 : f32
    %213 = vector.broadcast %cst_74 : f32 to vector<16x64xf32>
    %214 = arith.addf %212, %213 : vector<16x64xf32>
    %215 = arith.mulf %214, %207 : vector<16x64xf32>
    %cst_75 = arith.constant -0.284496725 : f32
    %216 = vector.broadcast %cst_75 : f32 to vector<16x64xf32>
    %217 = arith.addf %215, %216 : vector<16x64xf32>
    %218 = arith.mulf %217, %207 : vector<16x64xf32>
    %cst_76 = arith.constant 0.254829586 : f32
    %219 = vector.broadcast %cst_76 : f32 to vector<16x64xf32>
    %220 = arith.addf %218, %219 : vector<16x64xf32>
    %221 = arith.mulf %220, %207 : vector<16x64xf32>
    %cst_77 = arith.constant 0.000000e+00 : f32
    %222 = vector.broadcast %cst_77 : f32 to vector<16x64xf32>
    %223 = arith.subf %222, %201 : vector<16x64xf32>
    %224 = arith.mulf %223, %201 : vector<16x64xf32>
    %225 = math.exp %224 : vector<16x64xf32>
    %226 = arith.mulf %221, %225 : vector<16x64xf32>
    %cst_78 = arith.constant 1.000000e+00 : f32
    %227 = vector.broadcast %cst_78 : f32 to vector<16x64xf32>
    %228 = arith.subf %227, %226 : vector<16x64xf32>
    %229 = arith.mulf %200, %228 : vector<16x64xf32>
    %cst_79 = arith.constant 1.000000e+00 : f32
    %230 = vector.broadcast %cst_79 : f32 to vector<16x64xf32>
    %231 = arith.addf %230, %229 : vector<16x64xf32>
    %232 = arith.mulf %193, %231 : vector<16x64xf32>
    %c152 = arith.constant 152 : index
    %c0_80 = arith.constant 0 : index
    %233 = vector.load %arg3[%c152, %c0_80] : memref<232x128xf32, #tpu.memory_space<vmem>>, vector<64x128xf32>
    %cst_81 = arith.constant dense<0.000000e+00> : vector<16x128xf32>
    %234 = tpu.matmul %232, %233, %cst_81 {dimension_numbers = #tpu.dot_dimension_numbers<[1], [0], [0], [1], [0, 0, 1, 1], [], []>} : vector<16x64xf32>, vector<64x128xf32>, vector<16x128xf32> -> vector<16x128xf32>
    %c229 = arith.constant 229 : index
    %c0_82 = arith.constant 0 : index
    %235 = vector.load %arg3[%c229, %c0_82] : memref<232x128xf32, #tpu.memory_space<vmem>>, vector<1x128xf32>
    %236 = vector.broadcast %235 : vector<1x128xf32> to vector<16x128xf32>
    %237 = arith.addf %234, %236 : vector<16x128xf32>
    %238 = arith.addf %237, %163 : vector<16x128xf32>
    %c0_83 = arith.constant 0 : index
    %c0_84 = arith.constant 0 : index
    %239 = vector.load %arg4[%c0_83, %c0_84] : memref<16x128xf32, #tpu.memory_space<vmem>>, vector<16x128xf32>
    tpu.vector_store %arg4[%c0_83, %c0_84], %238 {strides = array<i32>} : memref<16x128xf32, #tpu.memory_space<vmem>>, vector<16x128xf32>,
    return
  }
}

</mosaic_0001>

<bundles_post_ra>
// kernel: tile.19
= control target key start
LH: loop header
LB: loop body
LE: loop exit
PB: predicated region body
PF: predicated region fallthrough
CT: control target
= control target key end

     0   :  { %vm16_vm0 = vcmask 261120   ;;  %vm22_vm1 = vcmask 523520   ;;  %s57_s0 = inlined_call_operand.vmem [shape: f32[2,32,3], index: 0, kind: input, shape index: {}]   ;;  %s58_s1 = inlined_call_operand.vmem [shape: f32[64,3], index: 1, kind: output, shape index: {}]  }
   0x1   :  { %v31_v0 = vld [vmem:[%s57_s0 + $0x4] sm:$0x3]  ;;  %v32_v1 = vld [vmem:[%s57_s0 + $0x2] sm:$0x3]  ;;  %v13_v2 = vld [vmem:[%s57_s0] sm:$0x3] }
   0x2   :  { %8 = vst [vmem:[#allocation1 + $0x10] sm:$0x3] %v31_v0  ;;  %12 = vst [vmem:[#allocation1 + $0x8] sm:$0x3] %v32_v1  ;;  %s34_s0 = smov 32  }
   0x3   :  { %14 = vst [vmem:[#allocation1] sm:$0x3] %v13_v2 }
   0xa   :  { %v19_v3 = vld [vmem:[#allocation1 + $0x1] ss:$8 sm:$0x7]   ;;  %v15_v4 = vld [vmem:[#allocation1] ss:$8 sm:$0x7]  }
   0xb   :  { %20 = vrot.lane.b32.xlu0 %v19_v3, %s34_s0  ;;  %17 = vst.msk [vmem:[#allocation0] sm:$0x7] %vm16_vm0, %v15_v4  }
  0x7d   :  { %v21_v5 = vpop.permute.xlu0 %20  }
  0x7e   :  { %23 = vst.msk [vmem:[#allocation0] sm:$0x7] %vm22_vm1, %v21_v5  }
  0x85   :  { %v27_v6 = vld [vmem:[#allocation0] sm:$0xf] }
  0x86   :  { %29 = vst [vmem:[%s58_s1] sm:$0xf] %v27_v6 }

// kernel: tile.14
= control target key start
LH: loop header
LB: loop body
LE: loop exit
PB: predicated region body
PF: predicated region fallthrough
CT: control target
= control target key end

     0   :  { %s10_s10 = smov 3  ;;  %vm12_vm0 = vcmask 261120   ;;  %s29_s11 = smov 32   ;;  %vm19_vm1 = vcmask 523520   ;;  %s49_s0 = inlined_call_operand.vmem [shape: f32[2,32,2], index: 0, kind: input, shape index: {}]   ;;  %s50_s1 = inlined_call_operand.vmem [shape: f32[64,2], index: 1, kind: output, shape index: {}]  }
   0x1   :  { %v27_v0 = vld [vmem:[%s49_s0 + $0x2] sm:$0x3]  ;;  %v8_v1 = vld [vmem:[%s49_s0] sm:$0x3]  ;;  %s15_s0 = smov 3 }
   0x2   :  { %7 = vst [vmem:[#allocation1 + $0x8] sm:$0x3] %v27_v0  ;;  %9 = vst [vmem:[#allocation1] sm:$0x3] %v8_v1 }
   0x9   :  { %v16_v2 = vld [vmem:[#allocation1 + $0x1] ss:$8 sm:%s15_s0]   ;;  %v11_v3 = vld [vmem:[#allocation1] ss:$8 sm:%s10_s10]  }
   0xa   :  { %17 = vrot.lane.b32.xlu0 %v16_v2, %s29_s11  ;;  %13 = vst.msk [vmem:[#allocation0] sm:$0x3] %vm12_vm0, %v11_v3  }
  0x7c   :  { %v18_v4 = vpop.permute.xlu0 %17  }
  0x7d   :  { %20 = vst.msk [vmem:[#allocation0] sm:$0x3] %vm19_vm1, %v18_v4  }
  0x84   :  { %v24_v5 = vld [vmem:[#allocation0] sm:$0x3] }
  0x85   :  { %26 = vst [vmem:[%s50_s1] sm:$0x3] %v24_v5 }

// kernel: run.1
= control target key start
LH: loop header
LB: loop body
LE: loop exit
PB: predicated region body
PF: predicated region fallthrough
CT: control target
= control target key end

     0   :  { %vm33_vm0 = vcmask 1043456   ;;  %vm26_vm1 = vcmask 31744   ;;  %s3271_s0 = inlined_call_operand.vmem [shape: f32[16,4], index: 0, kind: input, shape index: {}]   ;;  %s3272_s1 = inlined_call_operand.vmem [shape: f32[64,6], index: 1, kind: input, shape index: {}]   ;;  %s3273_s2 = inlined_call_operand.vmem [shape: f32[64,5], index: 2, kind: input, shape index: {}]   ;;  %s3274_s3 = inlined_call_operand.vmem [shape: f32[232,128], index: 3, kind: input, shape index: {}]   ;;  %s3275_s4 = inlined_call_operand.hbm [shape: f32[16,128], index: 4, kind: output, shape index: {}]  }
   0x1   :  { %v20_v0 = vld [vmem:[%s3274_s3 + $0x8] sm:$0xf]  ;;  %v18_v1 = vld [vmem:[%s3271_s0] sm:$0xff] }
   0x2   :  { %v19_v2 = vld [vmem:[%s3271_s0 + $0x8] sm:$0xff]  ;;  %2364 = vmatprep.subr.msk.mxu0 %vm33_vm0, %v20_v0  ;;  %2366 = vmatprep.mubr.msk.f32.mxu0 %vm26_vm1, %v18_v1 }
   0x3   :  { %9 = vsyncpa [#allocation3], 0  ;;  %2365 = vmatpush3.msk.msra.mxu0 %vm33_vm0, %v20_v0  ;;  %v2169_v3 = vld [vmem:[%s3274_s3 + $0xd9] ss:$0 sm:$0xff]  ;;  %vm114_vm2 = vcmask 261120   ;;  %v155_v21 = vld [vmem:[%s3274_s3 + $0x20] sm:$0xff] }
   0x4   :  { %2367 = vmatmul.mubr.msk.f32.vlgmr.msra.gmra.mrb[0].mxu0 %vm26_vm1, %v19_v2  ;;  %v154_v20 = vld [vmem:[%s3274_s3 + $0x18] sm:$0xff]  ;;  %v156_v23 = vld [vmem:[%s3274_s3 + $0x28] sm:$0xff]  ;;  %v157_v24 = vld [vmem:[%s3274_s3 + $0x30] sm:$0xff]  ;;  %vm283_vm3 = vcmask 1045504   ;;  %vm258_vm4 = vcmask 48128   ;;  %vm699_vm5 = vcmask 1044480  }
   0x5   :  { %v2538_v22 = vpack.c.bf16 %v155_v21, %v154_v20  ;;  %v2542_v25 = vpack.c.bf16 %v157_v24, %v156_v23  ;;  %v252_v26 = vld [vmem:[%s3274_s3] sm:$0x3f]  ;;  %v2173_v34 = vld [vmem:[%s3274_s3 + $0xdc] ss:$0 sm:$0xff]  ;;  %v2174_v36 = vld [vmem:[%s3274_s3 + $0xdd] ss:$0 sm:$0xff] }
   0x6   :  { %v244_v43 = vld [vmem:[%s3272_s1] sm:$0xff]  ;;  %v245_v44 = vld [vmem:[%s3272_s1 + $0x8] sm:$0xff]  ;;  %v246_v45 = vld [vmem:[%s3272_s1 + $0x10] sm:$0xff]  ;;  %vm674_vm6 = vcmask 39936   ;;  %s2702_s5 = smov 32   ;;  %s2704_s8 = smov 96  }
   0x7   :  { %2539 = vmatprep.subr.bf16.mxu0 %v2538_v22  ;;  %v247_v46 = vld [vmem:[%s3272_s1 + $0x18] sm:$0xff]  ;;  %v248_v47 = vld [vmem:[%s3272_s1 + $0x20] sm:$0xff]  ;;  %v249_v48 = vld [vmem:[%s3272_s1 + $0x28] sm:$0xff]  ;;  %s2707_s22 = smov [#allocation2]  }
   0x8   :  { %2541 = vmatpush3.bf16.msra.mxu0 %v2538_v22  ;;  %v250_v49 = vld [vmem:[%s3272_s1 + $0x30] sm:$0xff]  ;;  %v251_v50 = vld [vmem:[%s3272_s1 + $0x38] sm:$0xff]  ;;  %s2158_s0 = sshll.u32 %s2707_s22, 4  ;;  %s2159_s0 = int_to_ptr.vmem [resolvable:$true] %s2158_s0 }
   0x9   :  { %2543 = vmatprep.subr.bf16.mxu0 %v2542_v25  ;;  %v2178_v53 = vld [vmem:[%s3274_s3 + $0xd8] ss:$0 sm:$0xff]  ;;  %s2678_s23 = scalar_lea.vmem %s2159_s0, 256  ;;  %p2683_p1 = scmp.lt.s32.totalorder %s2159_s0, %s2159_s0 }
   0xa   :  { %p2679_p0 = scmp.ne.s32.totalorder %s2159_s0, %s2678_s23  ;;  %p2684_p2 = scmp.lt.s32.totalorder %s2678_s23, %s2678_s23 }
   0xc   :  { %2545 = vmatpush3.bf16.msra.mxu0 %v2542_v25  ;;  %p2685_p3 = por %p2684_p2, %p2683_p1 }
   0xd   :  { %2380 = vmatprep.subr.msk.mxu0 %vm283_vm3, %v252_v26 }
   0xe   :  { %p2686_p4 = pnand %p2685_p3, %p2679_p0 }
  0xd7   :  { %v2368_v4 = vpop.f32.mrb[0].mxu0 }
  0xd8   :  { %v103_v5 = vpop.f32.mrb[1].mxu0  ;;  %v2753_v7 = vadd.f32 %v2368_v4, %v2169_v3 }
  0xd9   :  { %v2751_v6 = vadd.f32 %v2169_v3, %v103_v5 }
  0xda   :  { %v118_v9 = vsel %vm114_vm2, %v2753_v7, 0.0 }
  0xdb   :  { %v115_v8 = vsel %vm114_vm2, %v2751_v6, 0.0 }
  0xdc   :  { %116 = vadd.xlane.f32.xlu0 %v115_v8 }
  0xe0   :  { %119 = vadd.xlane.f32.xlu0 %v118_v9 }
 0x169   :  { %v117_v10 = vpop.xlane.xlu0 %116 }
 0x16a   :  { %v122_v11 = vmul.f32 0.03125, %v117_v10 }
 0x16c   :  { %v124_v12 = vsub.f32 %v2751_v6, %v122_v11 }
 0x16d   :  { %v120_v13 = vpop.xlane.xlu0 %119 }
 0x16e   :  { %v123_v14 = vmul.f32 0.03125, %v120_v13  ;;  %v126_v15 = vmul.f32 %v124_v12, %v124_v12 }
 0x170   :  { %v125_v16 = vsub.f32 %v2753_v7, %v123_v14  ;;  %v128_v17 = vsel %vm114_vm2, %v126_v15, 0.0 }
 0x171   :  { %129 = vadd.xlane.f32.xlu1 %v128_v17 }
 0x172   :  { %v127_v18 = vmul.f32 %v125_v16, %v125_v16 }
 0x174   :  { %v131_v19 = vsel %vm114_vm2, %v127_v18, 0.0 }
 0x175   :  { %132 = vadd.xlane.f32.xlu1 %v131_v19 }
 0x1fe   :  { %v130_v27 = vpop.xlane.xlu1 %129 }
 0x1ff   :  { %v134_v28 = vmul.f32 0.03125, %v130_v27 }
 0x201   :  { %v136_v29 = vadd.f32 1e-05, %v134_v28 }
 0x202   :  { %v133_v30 = vpop.xlane.xlu1 %132 }
 0x203   :  { %2626 = vrsqrt.f32 %v136_v29  ;;  %v135_v31 = vmul.f32 0.03125, %v133_v30 }
 0x205   :  { %v137_v32 = vadd.f32 1e-05, %v135_v31 }
 0x207   :  { %2628 = vrsqrt.f32 %v137_v32 }
 0x20d   :  { %v2627_v33 = vpop.eup %2626 }
 0x20e   :  { %v140_v35 = vmul.f32 %v2627_v33, %v124_v12 }
 0x210   :  { %v146_v37 = vmul.f32 %v2173_v34, %v140_v35 }
 0x211   :  { %v2629_v38 = vpop.eup %2628 }
 0x212   :  { %v141_v39 = vmul.f32 %v2629_v38, %v125_v16  ;;  %v152_v40 = vadd.f32 %v2174_v36, %v146_v37 }
 0x214   :  { %v147_v41 = vmul.f32 %v2173_v34, %v141_v39  ;;  %2377 = vmatprep.mubr.msk.f32.mxu0 %vm114_vm2, %v152_v40 }
 0x216   :  { %v153_v42 = vadd.f32 %v2174_v36, %v147_v41 }
 0x218   :  { %2378 = vmatmul.mubr.msk.f32.vlgmr.msra.gmra.mrb[2].mxu0 %vm114_vm2, %v153_v42 }
 0x219   :  { %2381 = vmatpush3.msk.msra.mxu0 %vm283_vm3, %v252_v26  ;;  %2382 = vmatprep.mubr.msk.f32.mxu0 %vm258_vm4, %v244_v43 }
 0x21c   :  { %2383 = vmatmul.mubr.msk.f32.vlgmr.msra.gmra.mrb[4].mxu0 %vm258_vm4, %v245_v44 }
 0x21d   :  { %2385 = vmatprep.mubr.msk.f32.mxu0 %vm258_vm4, %v246_v45 }
 0x220   :  { %2386 = vmatmul.mubr.msk.f32.gmra.mrb[6].mxu0 %vm258_vm4, %v247_v46 }
 0x221   :  { %2388 = vmatprep.mubr.msk.f32.mxu0 %vm258_vm4, %v248_v47 }
 0x224   :  { %2389 = vmatmul.mubr.msk.f32.gmra.mrb[8].mxu0 %vm258_vm4, %v249_v48 }
 0x225   :  { %2391 = vmatprep.mubr.msk.f32.mxu0 %vm258_vm4, %v250_v49 }
 0x228   :  { %2392 = vmatmul.mubr.msk.f32.gmra.mrb[10].mxu0 %vm258_vm4, %v251_v50 }
 0x2eb   :  { %v2820_v51 = vpop.f32.mrb[2].mxu0 }
 0x2ec   :  { %v2822_v52 = vpop.f32.mrb[3].mxu0 }
 0x2ef   :  { %v2384_v54 = vpop.f32.mrb[4].mxu0 }
 0x2f0   :  { %v359_v55 = vadd.f32 %v2384_v54, %v2178_v53  ;;  %v353_v56 = vpop.f32.mrb[5].mxu0 }
 0x2f1   :  { %v354_v57 = vadd.f32 %v2178_v53, %v353_v56 }
 0x2f2   :  { %v397_v58 = vsel %vm114_vm2, %v359_v55, 0.0 }
 0x2f3   :  { %398 = vadd.xlane.f32.xlu1 %v397_v58  ;;  %v2387_v59 = vpop.f32.mrb[6].mxu0  ;;  %v394_v60 = vsel %vm114_vm2, %v354_v57, 0.0  ;;  %v668_v58 = vld [vmem:[%s3274_s3 + $0x10] sm:$0x1f] }
 0x2f4   :  { %v369_v61 = vadd.f32 %v2387_v59, %v2178_v53  ;;  %v363_v62 = vpop.f32.mrb[7].mxu0  ;;  %395 = vadd.xlane.f32.xlu0 %v394_v60  ;;  %2414 = vmatprep.subr.msk.mxu0 %vm699_vm5, %v668_v58  ;;  %v522_v59 = vld [vmem:[%s3274_s3 + $0x38] sm:$0xff]  ;;  %v523_v60 = vld [vmem:[%s3274_s3 + $0x40] sm:$0xff] }
 0x2f5   :  { %v364_v63 = vadd.f32 %v2178_v53, %v363_v62  ;;  %2415 = vmatpush3.msk.msra.mxu0 %vm699_vm5, %v668_v58  ;;  %v524_v62 = vld [vmem:[%s3274_s3 + $0x48] sm:$0xff] }
 0x2f6   :  { %v403_v0 = vsel %vm114_vm2, %v369_v61, 0.0 }
 0x2f7   :  { %404 = vadd.xlane.f32.xlu1 %v403_v0  ;;  %v2390_v1 = vpop.f32.mrb[8].mxu0  ;;  %v400_v2 = vsel %vm114_vm2, %v364_v63, 0.0 }
 0x2f8   :  { %v379_v3 = vadd.f32 %v2390_v1, %v2178_v53  ;;  %v373_v4 = vpop.f32.mrb[9].mxu0  ;;  %401 = vadd.xlane.f32.xlu0 %v400_v2  ;;  %v660_v1 = vld [vmem:[%s3273_s2] sm:$0xff]  ;;  %v661_v2 = vld [vmem:[%s3273_s2 + $0x8] sm:$0xff] }
 0x2f9   :  { %v374_v5 = vadd.f32 %v2178_v53, %v373_v4  ;;  %2416 = vmatprep.mubr.msk.f32.mxu0 %vm674_vm6, %v660_v1  ;;  %v663_v4 = vld [vmem:[%s3273_s2 + $0x18] sm:$0xff] }
 0x2fa   :  { %v409_v8 = vsel %vm114_vm2, %v379_v3, 0.0  ;;  %2417 = vmatmul.mubr.msk.f32.vlgmr.msra.gmra.mrb[12].mxu0 %vm674_vm6, %v661_v2 }
 0x2fb   :  { %410 = vadd.xlane.f32.xlu1 %v409_v8  ;;  %v2393_v9 = vpop.f32.mrb[10].mxu0  ;;  %v406_v10 = vsel %vm114_vm2, %v374_v5, 0.0  ;;  %v665_v8 = vld [vmem:[%s3273_s2 + $0x28] sm:$0xff] }
 0x2fc   :  { %v389_v11 = vadd.f32 %v2393_v9, %v2178_v53  ;;  %v383_v12 = vpop.f32.mrb[11].mxu0  ;;  %407 = vadd.xlane.f32.xlu0 %v406_v10  ;;  %v666_v9 = vld [vmem:[%s3273_s2 + $0x30] sm:$0xff]  ;;  %v667_v10 = vld [vmem:[%s3273_s2 + $0x38] sm:$0xff] }
 0x2fd   :  { %v384_v13 = vadd.f32 %v2178_v53, %v383_v12 }
 0x2fe   :  { %v415_v14 = vsel %vm114_vm2, %v389_v11, 0.0 }
 0x2ff   :  { %416 = vadd.xlane.f32.xlu1 %v415_v14  ;;  %v412_v15 = vsel %vm114_vm2, %v384_v13, 0.0 }
 0x300   :  { %413 = vadd.xlane.f32.xlu0 %v412_v15 }
 0x380   :  { %v399_v16 = vpop.xlane.xlu1 %398 }
 0x381   :  { %v419_v17 = vmul.f32 0.03125, %v399_v16  ;;  %v396_v18 = vpop.xlane.xlu0 %395 }
 0x382   :  { %v418_v19 = vmul.f32 0.03125, %v396_v18 }
 0x383   :  { %v2835_v20 = vsub.f32 %v359_v55, %v419_v17 }
 0x384   :  { %v2837_v21 = vsub.f32 %v354_v57, %v418_v19  ;;  %v405_v22 = vpop.xlane.xlu1 %404 }
 0x385   :  { %v421_v23 = vmul.f32 0.03125, %v405_v22  ;;  %v402_v24 = vpop.xlane.xlu0 %401  ;;  %v435_v25 = vmul.f32 %v2835_v20, %v2835_v20 }
 0x386   :  { %v420_v26 = vmul.f32 0.03125, %v402_v24  ;;  %v434_v27 = vmul.f32 %v2837_v21, %v2837_v21 }
 0x387   :  { %v2843_v28 = vsub.f32 %v369_v61, %v421_v23  ;;  %v445_v29 = vsel %vm114_vm2, %v435_v25, 0.0  ;;  %v2546_v61 = vpack.c.bf16 %v523_v60, %v522_v59 }
 0x388   :  { %v2846_v30 = vsub.f32 %v364_v63, %v420_v26  ;;  %v411_v31 = vpop.xlane.xlu1 %410  ;;  %446 = vadd.xlane.f32.xlu1 %v445_v29  ;;  %v442_v32 = vsel %vm114_vm2, %v434_v27, 0.0  ;;  %v525_v63 = vld [vmem:[%s3274_s3 + $0x50] sm:$0xff] }
 0x389   :  { %v423_v33 = vmul.f32 0.03125, %v411_v31  ;;  %443 = vadd.xlane.f32.xlu0 %v442_v32  ;;  %v408_v34 = vpop.xlane.xlu0 %407  ;;  %v437_v35 = vmul.f32 %v2843_v28, %v2843_v28  ;;  %2547 = vmatprep.subr.bf16.mxu1 %v2546_v61  ;;  %v2550_v0 = vpack.c.bf16 %v525_v63, %v524_v62 }
 0x38a   :  { %v422_v36 = vmul.f32 0.03125, %v408_v34  ;;  %v436_v37 = vmul.f32 %v2846_v30, %v2846_v30  ;;  %2549 = vmatpush3.bf16.msra.mxu1 %v2546_v61 }
 0x38b   :  { %v2853_v38 = vsub.f32 %v379_v3, %v423_v33  ;;  %v451_v39 = vsel %vm114_vm2, %v437_v35, 0.0  ;;  %2551 = vmatprep.subr.bf16.mxu1 %v2550_v0  ;;  %v662_v3 = vld [vmem:[%s3273_s2 + $0x10] sm:$0xff] }
 0x38c   :  { %v2856_v40 = vsub.f32 %v374_v5, %v422_v36  ;;  %452 = vadd.xlane.f32.xlu1 %v451_v39  ;;  %v417_v41 = vpop.xlane.xlu1 %416  ;;  %v448_v42 = vsel %vm114_vm2, %v436_v37, 0.0  ;;  %2419 = vmatprep.mubr.msk.f32.mxu0 %vm674_vm6, %v662_v3  ;;  %v664_v5 = vld [vmem:[%s3273_s2 + $0x20] sm:$0xff] }
 0x38d   :  { %v425_v43 = vmul.f32 0.03125, %v417_v41  ;;  %449 = vadd.xlane.f32.xlu0 %v448_v42  ;;  %v414_v44 = vpop.xlane.xlu0 %413  ;;  %v439_v45 = vmul.f32 %v2853_v38, %v2853_v38  ;;  %2420 = vmatmul.mubr.msk.f32.gmra.mrb[14].mxu0 %vm674_vm6, %v663_v4  ;;  %v2188_v41 = vld [vmem:[%s3274_s3 + $0xda] ss:$0 sm:$0xff] }
 0x38e   :  { %v424_v46 = vmul.f32 0.03125, %v414_v44  ;;  %v438_v47 = vmul.f32 %v2856_v40, %v2856_v40  ;;  %2553 = vmatpush3.bf16.msra.mxu1 %v2550_v0  ;;  %2422 = vmatprep.mubr.msk.f32.mxu0 %vm674_vm6, %v664_v5 }
 0x38f   :  { %v2863_v48 = vsub.f32 %v389_v11, %v425_v43  ;;  %v457_v49 = vsel %vm114_vm2, %v439_v45, 0.0 }
 0x390   :  { %v2866_v50 = vsub.f32 %v384_v13, %v424_v46  ;;  %458 = vadd.xlane.f32.xlu1 %v457_v49  ;;  %v454_v53 = vsel %vm114_vm2, %v438_v47, 0.0  ;;  %v2189_v46 = vld [vmem:[%s3274_s3 + $0xdb] ss:$0 sm:$0xff] }
 0x391   :  { %455 = vadd.xlane.f32.xlu0 %v454_v53  ;;  %v441_v54 = vmul.f32 %v2863_v48, %v2863_v48  ;;  %2423 = vmatmul.mubr.msk.f32.gmra.mrb[16].mxu0 %vm674_vm6, %v665_v8 }
 0x392   :  { %v440_v55 = vmul.f32 %v2866_v50, %v2866_v50  ;;  %2425 = vmatprep.mubr.msk.f32.mxu0 %vm674_vm6, %v666_v9 }
 0x393   :  { %v463_v56 = vsel %vm114_vm2, %v441_v54, 0.0 }
 0x394   :  { %464 = vadd.xlane.f32.xlu1 %v463_v56  ;;  %v460_v57 = vsel %vm114_vm2, %v440_v55, 0.0 }
 0x395   :  { %461 = vadd.xlane.f32.xlu0 %v460_v57  ;;  %2426 = vmatmul.mubr.msk.f32.gmra.mrb[18].mxu0 %vm674_vm6, %v667_v10 }
 0x415   :  { %v447_v11 = vpop.xlane.xlu1 %446 }
 0x416   :  { %v467_v12 = vmul.f32 0.03125, %v447_v11  ;;  %v444_v13 = vpop.xlane.xlu0 %443  ;;  %v2418_v11 = vpop.f32.mrb[12].mxu0 }
 0x417   :  { %v466_v14 = vmul.f32 0.03125, %v444_v13 }
 0x418   :  { %v475_v15 = vadd.f32 1e-05, %v467_v12  ;;  %v769_v12 = vpop.f32.mrb[13].mxu0 }
 0x419   :  { %v474_v16 = vadd.f32 1e-05, %v466_v14  ;;  %v453_v17 = vpop.xlane.xlu1 %452 }
 0x41a   :  { %2630 = vrsqrt.f32 %v475_v15  ;;  %v469_v18 = vmul.f32 0.03125, %v453_v17  ;;  %v450_v19 = vpop.xlane.xlu0 %449  ;;  %v2199_v17 = vld [vmem:[%s3274_s3 + $0xe0] ss:$0 sm:$0xff] }
 0x41b   :  { %2632 = vrsqrt.f32 %v474_v16  ;;  %v468_v22 = vmul.f32 0.03125, %v450_v19  ;;  %v2950_v19 = vadd.f32 %v2418_v11, %v2199_v17 }
 0x41c   :  { %v477_v23 = vadd.f32 1e-05, %v469_v18  ;;  %v2190_v18 = vld [vmem:[%s3274_s3 + $0xdf] ss:$0 sm:$0xff] }
 0x41d   :  { %v476_v24 = vadd.f32 1e-05, %v468_v22  ;;  %v459_v25 = vpop.xlane.xlu1 %458 }
 0x41e   :  { %2634 = vrsqrt.f32 %v477_v23  ;;  %v471_v26 = vmul.f32 0.03125, %v459_v25  ;;  %v456_v27 = vpop.xlane.xlu0 %455  ;;  %v2952_v23 = vadd.f32 %v2199_v17, %v769_v12 }
 0x41f   :  { %2636 = vrsqrt.f32 %v476_v24  ;;  %v470_v29 = vmul.f32 0.03125, %v456_v27 }
 0x420   :  { %v479_v31 = vadd.f32 1e-05, %v471_v26 }
 0x421   :  { %v478_v32 = vadd.f32 1e-05, %v470_v29  ;;  %v465_v33 = vpop.xlane.xlu1 %464 }
 0x422   :  { %2638 = vrsqrt.f32 %v479_v31  ;;  %v473_v34 = vmul.f32 0.03125, %v465_v33  ;;  %v462_v35 = vpop.xlane.xlu0 %461 }
 0x423   :  { %2640 = vrsqrt.f32 %v478_v32  ;;  %v472_v36 = vmul.f32 0.03125, %v462_v35 }
 0x424   :  { %v2631_v37 = vpop.eup %2630  ;;  %v481_v39 = vadd.f32 1e-05, %v473_v34 }
 0x425   :  { %v2633_v42 = vpop.eup %2632  ;;  %v480_v43 = vadd.f32 1e-05, %v472_v36  ;;  %v491_v44 = vmul.f32 %v2631_v37, %v2835_v20 }
 0x426   :  { %2642 = vrsqrt.f32 %v481_v39  ;;  %v490_v45 = vmul.f32 %v2633_v42, %v2837_v21 }
 0x427   :  { %2644 = vrsqrt.f32 %v480_v43  ;;  %v503_v47 = vmul.f32 %v2188_v41, %v491_v44 }
 0x428   :  { %v2635_v49 = vpop.eup %2634  ;;  %v502_v53 = vmul.f32 %v2188_v41, %v490_v45 }
 0x429   :  { %v2637_v54 = vpop.eup %2636  ;;  %v493_v55 = vmul.f32 %v2635_v49, %v2843_v28  ;;  %v515_v58 = vadd.f32 %v2189_v46, %v503_v47 }
 0x42a   :  { %v514_v56 = vadd.f32 %v2189_v46, %v502_v53  ;;  %v492_v57 = vmul.f32 %v2637_v54, %v2846_v30 }
 0x42b   :  { %v505_v59 = vmul.f32 %v2188_v41, %v493_v55 }
 0x42c   :  { %v2639_v20 = vpop.eup %2638  ;;  %2402 = vmatprep.mubr.msk.f32.mxu1 %vm114_vm2, %v514_v56  ;;  %v504_v21 = vmul.f32 %v2188_v41, %v492_v57 }
 0x42d   :  { %v2641_v60 = vpop.eup %2640  ;;  %2403 = vmatmul.mubr.msk.f32.vlgmr.msra.gmra.mrb[0].mxu1 %vm114_vm2, %v515_v58  ;;  %v495_v61 = vmul.f32 %v2639_v20, %v2853_v38  ;;  %v517_v0 = vadd.f32 %v2189_v46, %v505_v59 }
 0x42e   :  { %v516_v62 = vadd.f32 %v2189_v46, %v504_v21  ;;  %v494_v63 = vmul.f32 %v2641_v60, %v2856_v40  ;;  %v856_v21 = vlaneseq }
 0x42f   :  { %v507_v1 = vmul.f32 %v2188_v41, %v495_v61 }
 0x430   :  { %v2643_v28 = vpop.eup %2642  ;;  %2405 = vmatprep.mubr.msk.f32.mxu1 %vm114_vm2, %v516_v62  ;;  %v506_v30 = vmul.f32 %v2188_v41, %v494_v63  ;;  %v3006_v60 = vshrl.u32 %v856_v21, 7  ;;  %v3008_v61 = vand.u32 127, %v856_v21 }
 0x431   :  { %v2645_v2 = vpop.eup %2644  ;;  %2406 = vmatmul.mubr.msk.f32.gmra.mrb[2].mxu1 %vm114_vm2, %v517_v0  ;;  %v497_v3 = vmul.f32 %v2643_v28, %v2863_v48  ;;  %v519_v8 = vadd.f32 %v2189_v46, %v507_v1 }
 0x432   :  { %v518_v4 = vadd.f32 %v2189_v46, %v506_v30  ;;  %v496_v5 = vmul.f32 %v2645_v2, %v2866_v50  ;;  %v858_v62 = vadd.s32 8, %v3006_v60  ;;  %v863_v63 = vmul.u32 8, %v3008_v61 }
 0x433   :  { %v509_v9 = vmul.f32 %v2188_v41, %v497_v3  ;;  %v868_v0 = vadd.s32 1, %v3008_v61  ;;  %v859_v1 = vadd.s32 16, %v3006_v60  ;;  %v860_v30 = vadd.s32 24, %v3006_v60 }
 0x434   :  { %2408 = vmatprep.mubr.msk.f32.mxu1 %vm114_vm2, %v518_v4  ;;  %v508_v38 = vmul.f32 %v2188_v41, %v496_v5  ;;  %vm864_vm7 = vcmp.ge.s32.totalorder %v3006_v60, %v863_v63  ;;  %vm865_vm8 = vcmp.ge.s32.totalorder %v858_v62, %v863_v63  ;;  %v2703_v3 = vmov 1.0|1.0   ;;  %v2175_v5 = vld [vmem:[%s3274_s3 + $0xde] ss:$0 sm:$0xff] }
 0x435   :  { %2409 = vmatmul.mubr.msk.f32.gmra.mrb[4].mxu1 %vm114_vm2, %v519_v8  ;;  %v521_v10 = vadd.f32 %v2189_v46, %v509_v9  ;;  %v869_v28 = vmul.u32 8, %v868_v0  ;;  %vm866_vm12 = vcmp.ge.s32.totalorder %v859_v1, %v863_v63  ;;  %vm867_vm15 = vcmp.ge.s32.totalorder %v860_v30, %v863_v63 }
 0x436   :  { %v520_v40 = vadd.f32 %v2189_v46, %v508_v38  ;;  %v3059_v8 = vadd.f32 %v2820_v51, %v2175_v5  ;;  %v3062_v9 = vadd.f32 %v2175_v5, %v2822_v52 }
 0x437   :  { %vm870_vm9 = vcmp.lt.s32.totalorder %v3006_v60, %v869_v28  ;;  %vm871_vm10 = vcmp.lt.s32.totalorder %v858_v62, %v869_v28  ;;  %vm872_vm13 = vcmp.lt.s32.totalorder %v859_v1, %v869_v28  ;;  %vm873_vm3 = vcmp.lt.s32.totalorder %v860_v30, %v869_v28 }
 0x438   :  { %2411 = vmatprep.mubr.msk.f32.mxu1 %vm114_vm2, %v520_v40  ;;  %vm874_vm11 = vmand %vm864_vm7, %vm870_vm9 }
 0x439   :  { %2412 = vmatmul.mubr.msk.f32.gmra.mrb[6].mxu1 %vm114_vm2, %v521_v10  ;;  %vm875_vm14 = vmand %vm865_vm8, %vm871_vm10 }
 0x43a   :  { %vm3017_vm4 = vmpackc.low %vm875_vm14, %vm874_vm11 }
 0x43b   :  { %2555 = vmatprep.subr.msk.bf16.mxu1 %vm3017_vm4, %v2703_v3  ;;  %2563 = vmatprep.subr.msk.bf16.mxu0 %vm3017_vm4, %v2703_v3  ;;  %vm876_vm5 = vmand %vm866_vm12, %vm872_vm13 }
 0x43c   :  { %2557 = vmatpush3.bf16.msk.msra.mxu1 %vm3017_vm4, %v2703_v3  ;;  %2565 = vmatpush3.bf16.msk.msra.mxu0 %vm3017_vm4, %v2703_v3  ;;  %vm877_vm6 = vmand %vm867_vm15, %vm873_vm3 }
 0x43d   :  { %vm3033_vm7 = vmpackc.low %vm877_vm6, %vm876_vm5 }
 0x43e   :  { %2559 = vmatprep.subr.msk.bf16.mxu1 %vm3033_vm7, %v2703_v3  ;;  %2567 = vmatprep.subr.msk.bf16.mxu0 %vm3033_vm7, %v2703_v3 }
 0x440   :  { %2561 = vmatpush3.bf16.msk.msra.mxu1 %vm3033_vm7, %v2703_v3  ;;  %2569 = vmatpush3.bf16.msk.msra.mxu0 %vm3033_vm7, %v2703_v3 }
 0x441   :  { %2571 = vmatprep.subr.msk.bf16.mxu1 %vm3017_vm4, %v2703_v3  ;;  %2579 = vmatprep.subr.msk.bf16.mxu0 %vm3017_vm4, %v2703_v3 }
 0x460   :  { %v2421_v13 = vpop.f32.mrb[14].mxu0 }
 0x461   :  { %v779_v48 = vpop.f32.mrb[15].mxu0  ;;  %v2960_v29 = vadd.f32 %v2421_v13, %v2199_v17 }
 0x462   :  { %v2970_v36 = vadd.f32 %v2199_v17, %v779_v48 }
 0x464   :  { %v2424_v14 = vpop.f32.mrb[16].mxu0 }
 0x465   :  { %v789_v15 = vpop.f32.mrb[17].mxu0  ;;  %v2983_v46 = vadd.f32 %v2424_v14, %v2199_v17 }
 0x466   :  { %v2974_v41 = vadd.f32 %v2199_v17, %v789_v15 }
 0x468   :  { %v2427_v50 = vpop.f32.mrb[18].mxu0 }
 0x469   :  { %v799_v16 = vpop.f32.mrb[19].mxu0  ;;  %v2997_v58 = vadd.f32 %v2427_v50, %v2199_v17 }
 0x46a   :  { %v2987_v53 = vadd.f32 %v2199_v17, %v799_v16 }
 0x500   :  { %v2404_v22 = vpop.f32.mrb[0].mxu1 }
 0x501   :  { %v2954_v24 = vadd.f32 %v2404_v22, %v2190_v18  ;;  %v621_v25 = vpop.f32.mrb[1].mxu1 }
 0x502   :  { %v2956_v26 = vadd.f32 %v2190_v18, %v621_v25 }
 0x503   :  { %v809_v27 = vadd.f32 %v2950_v19, %v2954_v24 }
 0x504   :  { %v808_v31 = vadd.f32 %v2952_v23, %v2956_v26  ;;  %v2407_v32 = vpop.f32.mrb[2].mxu1 }
 0x505   :  { %v2964_v33 = vadd.f32 %v2407_v32, %v2190_v18  ;;  %898 = vrot.lane.b32.xlu1 %v809_v27, %s2702_s5  ;;  %v631_v34 = vpop.f32.mrb[3].mxu1 }
 0x506   :  { %896 = vrot.lane.b32.xlu0 %v808_v31, %s2702_s5  ;;  %v2972_v37 = vadd.f32 %v2190_v18, %v631_v34 }
 0x507   :  { %v811_v35 = vadd.f32 %v2960_v29, %v2964_v33 }
 0x508   :  { %v2410_v39 = vpop.f32.mrb[4].mxu1  ;;  %v810_v44 = vadd.f32 %v2970_v36, %v2972_v37 }
 0x509   :  { %995 = vrot.lane.b32.xlu1 %v811_v35, %s2702_s5  ;;  %v641_v42 = vpop.f32.mrb[5].mxu1  ;;  %v2981_v45 = vadd.f32 %v2410_v39, %v2190_v18 }
 0x50a   :  { %v2977_v43 = vadd.f32 %v2190_v18, %v641_v42 }
 0x50b   :  { %v813_v56 = vadd.f32 %v2983_v46, %v2981_v45 }
 0x50c   :  { %v812_v47 = vadd.f32 %v2974_v41, %v2977_v43  ;;  %v2413_v49 = vpop.f32.mrb[6].mxu1 }
 0x50d   :  { %993 = vrot.lane.b32.xlu1 %v810_v44, %s2702_s5  ;;  %v651_v54 = vpop.f32.mrb[7].mxu1  ;;  %v2995_v57 = vadd.f32 %v2413_v49, %v2190_v18 }
 0x50e   :  { %v2990_v55 = vadd.f32 %v2190_v18, %v651_v54  ;;  %1090 = vrot.lane.b32.xlu0 %v812_v47, %s2702_s5 }
 0x50f   :  { %v815_v20 = vadd.f32 %v2997_v58, %v2995_v57 }
 0x510   :  { %v814_v59 = vadd.f32 %v2987_v53, %v2990_v55 }
 0x511   :  { %1092 = vrot.lane.b32.xlu1 %v813_v56, %s2702_s5 }
 0x512   :  { %1187 = vrot.lane.b32.xlu0 %v814_v59, %s2702_s5 }
 0x515   :  { %1189 = vrot.lane.b32.xlu1 %v815_v20, %s2702_s5 }
 0x577   :  { %v899_v38 = vpop.permute.xlu1 %898 }
 0x578   :  { %v903_v40 = vmul.f32 %v899_v38, %v3059_v8  ;;  %v897_v10 = vpop.permute.xlu0 %896 }
 0x579   :  { %v902_v11 = vmul.f32 %v897_v10, %v3062_v9 }
 0x57a   :  { %908 = vrot.lane.b32.xlu1 %v903_v40, %s2704_s8 }
 0x57b   :  { %v996_v12 = vpop.permute.xlu1 %995  ;;  %906 = vrot.lane.b32.xlu0 %v902_v11, %s2704_s8 }
 0x57c   :  { %v1000_v13 = vmul.f32 %v996_v12, %v3059_v8 }
 0x57e   :  { %1005 = vrot.lane.b32.xlu1 %v1000_v13, %s2704_s8 }
 0x57f   :  { %v994_v51 = vpop.permute.xlu1 %993 }
 0x580   :  { %v999_v52 = vmul.f32 %v994_v51, %v3062_v9  ;;  %v1091_v48 = vpop.permute.xlu0 %1090 }
 0x581   :  { %v1096_v15 = vmul.f32 %v1091_v48, %v3062_v9 }
 0x582   :  { %1003 = vrot.lane.b32.xlu0 %v999_v52, %s2704_s8 }
 0x583   :  { %v1093_v14 = vpop.permute.xlu1 %1092 }
 0x584   :  { %v1097_v50 = vmul.f32 %v1093_v14, %v3059_v8  ;;  %v1188_v16 = vpop.permute.xlu0 %1187 }
 0x585   :  { %v1193_v18 = vmul.f32 %v1188_v16, %v3062_v9 }
 0x586   :  { %1102 = vrot.lane.b32.xlu1 %v1097_v50, %s2704_s8  ;;  %1100 = vrot.lane.b32.xlu0 %v1096_v15, %s2704_s8 }
 0x587   :  { %v1190_v17 = vpop.permute.xlu1 %1189 }
 0x588   :  { %v1194_v22 = vmul.f32 %v1190_v17, %v3059_v8 }
 0x58a   :  { %1199 = vrot.lane.b32.xlu1 %v1194_v22, %s2704_s8  ;;  %1197 = vrot.lane.b32.xlu0 %v1193_v18, %s2704_s8 }
 0x58e   :  { %828 = vrot.lane.b32.xlu1 %v2970_v36, %s2702_s5  ;;  %824 = vrot.lane.b32.xlu0 %v2952_v23, %s2702_s5 }
 0x592   :  { %830 = vrot.lane.b32.xlu1 %v2960_v29, %s2702_s5  ;;  %826 = vrot.lane.b32.xlu0 %v2950_v19, %s2702_s5 }
 0x596   :  { %834 = vrot.lane.b32.xlu1 %v2983_v46, %s2702_s5  ;;  %832 = vrot.lane.b32.xlu0 %v2974_v41, %s2702_s5 }
 0x59a   :  { %838 = vrot.lane.b32.xlu1 %v2997_v58, %s2702_s5  ;;  %836 = vrot.lane.b32.xlu0 %v2987_v53, %s2702_s5  ;;  %v888_v58 = vadd.s32 1, %v3006_v60 }
 0x59c   :  { %v889_v59 = vmul.u32 8, %v888_v58  ;;  %v1779_v58 = vld [vmem:[%s3274_s3 + $0x60] sm:$0xff] }
 0x59e   :  { %vm890_vm9 = vcmp.lt.s32.totalorder %v3008_v61, %v889_v59  ;;  %v1780_v59 = vld [vmem:[%s3274_s3 + $0x68] sm:$0xff] }
 0x5ec   :  { %v909_v23 = vpop.permute.xlu1 %908 }
 0x5ed   :  { %v907_v25 = vpop.permute.xlu0 %906 }
 0x5ee   :  { %2436 = vmatprep.mubr.msk.f32.mxu1 %vm114_vm2, %v907_v25 }
 0x5ef   :  { %2437 = vmatmul.mubr.msk.f32.vlgmr.msra.gmra.mrb[8].mxu1 %vm114_vm2, %v909_v23 }
 0x5f0   :  { %2573 = vmatpush3.bf16.msk.msra.mxu1 %vm3017_vm4, %v2703_v3  ;;  %v1006_v19 = vpop.permute.xlu1 %1005 }
 0x5f1   :  { %2575 = vmatprep.subr.msk.bf16.mxu1 %vm3033_vm7, %v2703_v3 }
 0x5f4   :  { %v1004_v27 = vpop.permute.xlu0 %1003  ;;  %2577 = vmatpush3.bf16.msk.msra.mxu1 %vm3033_vm7, %v2703_v3 }
 0x5f5   :  { %2447 = vmatprep.mubr.msk.f32.mxu0 %vm114_vm2, %v1004_v27 }
 0x5f6   :  { %2448 = vmatmul.mubr.msk.f32.vlgmr.msra.gmra.mrb[20].mxu0 %vm114_vm2, %v1006_v19 }
 0x5f7   :  { %2581 = vmatpush3.bf16.msk.msra.mxu0 %vm3017_vm4, %v2703_v3 }
 0x5f8   :  { %v1103_v29 = vpop.permute.xlu1 %1102  ;;  %v1101_v31 = vpop.permute.xlu0 %1100  ;;  %2583 = vmatprep.subr.msk.bf16.mxu0 %vm3033_vm7, %v2703_v3 }
 0x5f9   :  { %2458 = vmatprep.mubr.msk.f32.mxu1 %vm114_vm2, %v1101_v31 }
 0x5fa   :  { %2459 = vmatmul.mubr.msk.f32.vlgmr.msra.gmra.mrb[10].mxu1 %vm114_vm2, %v1103_v29 }
 0x5fb   :  { %2585 = vmatpush3.bf16.msk.msra.mxu0 %vm3033_vm7, %v2703_v3 }
 0x5fc   :  { %v1200_v32 = vpop.permute.xlu1 %1199  ;;  %v1198_v34 = vpop.permute.xlu0 %1197 }
 0x5fd   :  { %2469 = vmatprep.mubr.msk.f32.mxu0 %vm114_vm2, %v1198_v34 }
 0x5fe   :  { %2470 = vmatmul.mubr.msk.f32.vlgmr.msra.gmra.mrb[22].mxu0 %vm114_vm2, %v1200_v32 }
 0x600   :  { %v829_v35 = vpop.permute.xlu1 %828  ;;  %v825_v36 = vpop.permute.xlu0 %824 }
 0x601   :  { %v850_v39 = vadd.f32 %v829_v35, %v2972_v37  ;;  %v848_v41 = vadd.f32 %v825_v36, %v2956_v26 }
 0x603   :  { %1477 = vrot.lane.b32.xlu1 %v850_v39, %s2704_s8  ;;  %1380 = vrot.lane.b32.xlu0 %v848_v41, %s2704_s8 }
 0x604   :  { %v831_v42 = vpop.permute.xlu1 %830  ;;  %v827_v44 = vpop.permute.xlu0 %826 }
 0x605   :  { %v851_v46 = vadd.f32 %v831_v42, %v2964_v33  ;;  %v849_v47 = vadd.f32 %v827_v44, %v2954_v24 }
 0x607   :  { %1479 = vrot.lane.b32.xlu1 %v851_v46, %s2704_s8  ;;  %1382 = vrot.lane.b32.xlu0 %v849_v47, %s2704_s8 }
 0x608   :  { %v835_v49 = vpop.permute.xlu1 %834  ;;  %v833_v53 = vpop.permute.xlu0 %832 }
 0x609   :  { %v853_v37 = vadd.f32 %v835_v49, %v2981_v45  ;;  %v852_v26 = vadd.f32 %v833_v53, %v2977_v43  ;;  %v886_v45 = vmul.u32 8, %v3006_v60  ;;  %v2705_v43 = vmov 0.0  }
 0x60b   :  { %1580 = vrot.lane.b32.xlu1 %v853_v37, %s2704_s8  ;;  %1578 = vrot.lane.b32.xlu0 %v852_v26, %s2704_s8  ;;  %vm887_vm8 = vcmp.ge.s32.totalorder %v3008_v61, %v886_v45 }
 0x60c   :  { %v839_v54 = vpop.permute.xlu1 %838  ;;  %v837_v56 = vpop.permute.xlu0 %836  ;;  %vm891_vm10 = vmand %vm887_vm8, %vm890_vm9 }
 0x60d   :  { %v855_v33 = vadd.f32 %v839_v54, %v2995_v57  ;;  %v854_v24 = vadd.f32 %v837_v56, %v2990_v55  ;;  %v3142_v20 = vsel %vm891_vm10, 1.0, %v2705_v43  ;;  %v1781_v43 = vld [vmem:[%s3274_s3 + $0x70] sm:$0xff] }
 0x60e   :  { %2472 = vmatprep.subr.msk.mxu1 %vm33_vm0, %v3142_v20  ;;  %2482 = vmatprep.subr.msk.mxu0 %vm33_vm0, %v3142_v20 }
 0x60f   :  { %1681 = vrot.lane.b32.xlu1 %v855_v33, %s2704_s8  ;;  %1679 = vrot.lane.b32.xlu0 %v854_v24, %s2704_s8  ;;  %v1778_v24 = vld [vmem:[%s3274_s3 + $0x58] sm:$0xff] }
 0x610   :  { %2473 = vmatpush3.msk.msra.mxu1 %vm33_vm0, %v3142_v20  ;;  %2483 = vmatpush3.msk.msra.mxu0 %vm33_vm0, %v3142_v20  ;;  %v2586_v45 = vpack.c.bf16 %v1779_v58, %v1778_v24  ;;  %v1912_v24 = vld [vmem:[%s3274_s3 + $0x88] sm:$0xff]  ;;  %v1913_v58 = vld [vmem:[%s3274_s3 + $0x90] sm:$0xff] }
 0x611   :  { %2477 = vmatprep.subr.msk.mxu1 %vm33_vm0, %v3142_v20  ;;  %2492 = vmatprep.subr.msk.mxu0 %vm33_vm0, %v3142_v20 }
 0x6c2   :  { %v2438_v55 = vpop.f32.mrb[8].mxu1 }
 0x6c3   :  { %v980_v57 = vpop.f32.mrb[9].mxu1  ;;  %v990_v60 = vmul.f32 0.35355338, %v2438_v55  ;;  %v1478_v55 = vpop.permute.xlu1 %1477 }
 0x6c4   :  { %v989_v63 = vmul.f32 0.35355338, %v980_v57  ;;  %v1381_v57 = vpop.permute.xlu0 %1380 }
 0x6c9   :  { %v2449_v21 = vpop.f32.mrb[20].mxu0 }
 0x6ca   :  { %v1087_v61 = vmul.f32 0.35355338, %v2449_v21  ;;  %v1077_v62 = vpop.f32.mrb[21].mxu0  ;;  %v1480_v21 = vpop.permute.xlu1 %1479 }
 0x6cb   :  { %v1086_v0 = vmul.f32 0.35355338, %v1077_v62 }
 0x6cc   :  { %v1283_v1 = vmax.f32 %v990_v60, %v1087_v61 }
 0x6cd   :  { %v1282_v28 = vmax.f32 %v989_v63, %v1086_v0  ;;  %v2460_v30 = vpop.f32.mrb[10].mxu1 }
 0x6ce   :  { %v1184_v2 = vmul.f32 0.35355338, %v2460_v30  ;;  %v1174_v3 = vpop.f32.mrb[11].mxu1 }
 0x6cf   :  { %v1183_v4 = vmul.f32 0.35355338, %v1174_v3 }
 0x6d0   :  { %v1285_v5 = vmax.f32 %v1283_v1, %v1184_v2 }
 0x6d1   :  { %v1284_v38 = vmax.f32 %v1282_v28, %v1183_v4  ;;  %v2471_v40 = vpop.f32.mrb[22].mxu0 }
 0x6d2   :  { %v1281_v10 = vmul.f32 0.35355338, %v2471_v40  ;;  %v1271_v11 = vpop.f32.mrb[23].mxu0 }
 0x6d3   :  { %v1280_v12 = vmul.f32 0.35355338, %v1271_v11 }
 0x6d4   :  { %v1287_v13 = vmax.f32 %v1285_v5, %v1281_v10 }
 0x6d5   :  { %v1286_v51 = vmax.f32 %v1284_v38, %v1280_v12 }
 0x6d6   :  { %v1289_v52 = vsub.f32 %v990_v60, %v1287_v13  ;;  %v1389_v48 = vsub.f32 %v1087_v61, %v1287_v13  ;;  %v1490_v14 = vsub.f32 %v1184_v2, %v1287_v13  ;;  %v1591_v15 = vsub.f32 %v1281_v10, %v1287_v13  ;;  %v1383_v60 = vpop.permute.xlu0 %1382 }
 0x6d7   :  { %v1288_v50 = vsub.f32 %v989_v63, %v1286_v51  ;;  %v1388_v16 = vsub.f32 %v1086_v0, %v1286_v51  ;;  %v1489_v17 = vsub.f32 %v1183_v4, %v1286_v51  ;;  %v1590_v18 = vsub.f32 %v1280_v12, %v1286_v51  ;;  %v1581_v63 = vpop.permute.xlu1 %1580 }
 0x6d8   :  { %v1292_v22 = vmul.f32 1.442695, %v1289_v52  ;;  %v1392_v25 = vmul.f32 1.442695, %v1389_v48  ;;  %v1493_v23 = vmul.f32 1.442695, %v1490_v14 }
 0x6d9   :  { %v1594_v19 = vmul.f32 1.442695, %v1591_v15  ;;  %v1290_v27 = vmul.f32 1.442695, %v1288_v50  ;;  %v1390_v29 = vmul.f32 1.442695, %v1388_v16 }
 0x6da   :  { %2646 = vpow2.f32 %v1292_v22  ;;  %v1491_v31 = vmul.f32 1.442695, %v1489_v17  ;;  %v1592_v32 = vmul.f32 1.442695, %v1590_v18  ;;  %v1579_v1 = vpop.permute.xlu0 %1578 }
 0x6db   :  { %2648 = vpow2.f32 %v1392_v25  ;;  %v1682_v11 = vpop.permute.xlu1 %1681 }
 0x6dc   :  { %2650 = vpow2.f32 %v1493_v23 }
 0x6dd   :  { %2652 = vpow2.f32 %v1594_v19 }
 0x6de   :  { %2654 = vpow2.f32 %v1290_v27  ;;  %v1680_v52 = vpop.permute.xlu0 %1679 }
 0x6df   :  { %2656 = vpow2.f32 %v1390_v29 }
 0x6e0   :  { %2658 = vpow2.f32 %v1491_v31  ;;  %v2253_v31 = vld [vmem:[%s3274_s3 + $0xe1] ss:$0 sm:$0xff] }
 0x6e1   :  { %2660 = vpow2.f32 %v1592_v32 }
 0x6e4   :  { %v2647_v34 = vpop.eup %2646 }
 0x6e5   :  { %v2649_v35 = vpop.eup %2648 }
 0x6e6   :  { %v2651_v36 = vpop.eup %2650  ;;  %v1486_v39 = vadd.f32 %v2649_v35, %v2647_v34 }
 0x6e7   :  { %v2653_v41 = vpop.eup %2652 }
 0x6e8   :  { %v2655_v42 = vpop.eup %2654  ;;  %v1587_v44 = vadd.f32 %v2651_v36, %v1486_v39 }
 0x6e9   :  { %v2657_v46 = vpop.eup %2656  ;;  %2474 = vmatprep.mubr.msk.f32.mxu1 %vm26_vm1, %v2655_v42 }
 0x6ea   :  { %v2659_v47 = vpop.eup %2658  ;;  %v1688_v49 = vadd.f32 %v2653_v41, %v1587_v44  ;;  %v1485_v53 = vadd.f32 %v2657_v46, %v2655_v42  ;;  %2475 = vmatmul.mubr.msk.f32.vlgmr.msra.gmra.mrb[12].mxu1 %vm26_vm1, %v2647_v34 }
 0x6eb   :  { %2484 = vmatprep.mubr.msk.f32.mxu0 %vm26_vm1, %v2659_v47  ;;  %2479 = vmatprep.mubr.msk.f32.mxu1 %vm26_vm1, %v2657_v46  ;;  %v2661_v26 = vpop.eup %2660 }
 0x6ec   :  { %v1586_v37 = vadd.f32 %v2659_v47, %v1485_v53  ;;  %2485 = vmatmul.mubr.msk.f32.vlgmr.msra.gmra.mrb[24].mxu0 %vm26_vm1, %v2651_v36  ;;  %2478 = vmatpush3.msk.msra.mxu1 %vm33_vm0, %v3142_v20 }
 0x6ed   :  { %2487 = vmatprep.subr.msk.mxu1 %vm33_vm0, %v3142_v20  ;;  %2493 = vmatpush3.msk.msra.mxu0 %vm33_vm0, %v3142_v20 }
 0x6ee   :  { %v1687_v54 = vadd.f32 %v2661_v26, %v1586_v37  ;;  %2480 = vmatmul.mubr.msk.f32.vlgmr.msra.gmra.mrb[14].mxu1 %vm26_vm1, %v2649_v35 }
 0x6ef   :  { %2489 = vmatprep.mubr.msk.f32.mxu1 %vm26_vm1, %v2661_v26  ;;  %2488 = vmatpush3.msk.msra.mxu1 %vm33_vm0, %v3142_v20  ;;  %v2590_v20 = vpack.c.bf16 %v1781_v43, %v1780_v59 }
 0x6f0   :  { %2662 = vrcp.f32 %v1687_v54  ;;  %2587 = vmatprep.subr.bf16.mxu1 %v2586_v45  ;;  %v1910_v54 = vld [vmem:[%s3274_s3 + $0x78] sm:$0xff] }
 0x6f1   :  { %2664 = vrcp.f32 %v1688_v49 }
 0x6f2   :  { %2490 = vmatmul.mubr.msk.f32.vlgmr.msra.gmra.mrb[16].mxu1 %vm26_vm1, %v2653_v41 }
 0x6f3   :  { %2589 = vmatpush3.bf16.msra.mxu1 %v2586_v45  ;;  %v2598_v45 = vpack.c.bf16 %v1913_v58, %v1912_v24 }
 0x6f4   :  { %2591 = vmatprep.subr.bf16.mxu1 %v2590_v20 }
 0x6f7   :  { %2593 = vmatpush3.bf16.msra.mxu1 %v2590_v20 }
 0x6fa   :  { %v2663_v56 = vpop.eup %2662 }
 0x6fb   :  { %v2665_v33 = vpop.eup %2664  ;;  %2494 = vmatprep.mubr.msk.f32.mxu0 %vm26_vm1, %v2663_v56  ;;  %v1911_v56 = vld [vmem:[%s3274_s3 + $0x80] sm:$0xff] }
 0x6fc   :  { %2495 = vmatmul.mubr.msk.f32.vlgmr.msra.gmra.mrb[26].mxu0 %vm26_vm1, %v2665_v33  ;;  %v2594_v33 = vpack.c.bf16 %v1911_v56, %v1910_v54 }
 0x6fe   :  { %2595 = vmatprep.subr.bf16.mxu0 %v2594_v33 }
 0x6ff   :  { %2597 = vmatpush3.bf16.msra.mxu0 %v2594_v33 }
 0x700   :  { %2599 = vmatprep.subr.bf16.mxu0 %v2598_v45 }
 0x703   :  { %2601 = vmatpush3.bf16.msra.mxu0 %v2598_v45 }
 0x7bd   :  { %v2476_v61 = vpop.f32.mrb[12].mxu1 }
 0x7be   :  { %v1369_v62 = vpop.f32.mrb[13].mxu1  ;;  %v1387_v2 = vmul.f32 %v2476_v61, %v1383_v60  ;;  %v2256_v61 = vld [vmem:[%s3274_s3 + $0xe2] ss:$0 sm:$0xff] }
 0x7bf   :  { %v2486_v0 = vpop.f32.mrb[24].mxu0  ;;  %v1386_v5 = vmul.f32 %v1381_v57, %v1369_v62 }
 0x7c0   :  { %v1567_v28 = vpop.f32.mrb[25].mxu0  ;;  %v1585_v40 = vmul.f32 %v2486_v0, %v1581_v63  ;;  %v2257_v63 = vld [vmem:[%s3274_s3 + $0xe3] ss:$0 sm:$0xff] }
 0x7c1   :  { %v2481_v30 = vpop.f32.mrb[14].mxu1  ;;  %v1584_v12 = vmul.f32 %v1579_v1, %v1567_v28 }
 0x7c2   :  { %v1484_v3 = vmul.f32 %v2481_v30, %v1480_v21  ;;  %v1466_v4 = vpop.f32.mrb[15].mxu1 }
 0x7c3   :  { %v1483_v38 = vmul.f32 %v1478_v55, %v1466_v4  ;;  %v2054_v4 = vld [vmem:[%s3274_s3 + $0x98] sm:$0xff] }
 0x7c4   :  { %v1488_v10 = vadd.f32 %v1484_v3, %v1387_v2 }
 0x7c5   :  { %v1487_v13 = vadd.f32 %v1483_v38, %v1386_v5  ;;  %v2491_v51 = vpop.f32.mrb[16].mxu1  ;;  %v2055_v5 = vld [vmem:[%s3274_s3 + $0xa0] sm:$0xff] }
 0x7c6   :  { %v1686_v48 = vmul.f32 %v2491_v51, %v1682_v11  ;;  %v1668_v14 = vpop.f32.mrb[17].mxu1  ;;  %v1589_v15 = vadd.f32 %v1585_v40, %v1488_v10  ;;  %v2602_v38 = vpack.c.bf16 %v2055_v5, %v2054_v4  ;;  %v2056_v40 = vld [vmem:[%s3274_s3 + $0xa8] sm:$0xff]  ;;  %v2057_v10 = vld [vmem:[%s3274_s3 + $0xb0] sm:$0xff] }
 0x7c7   :  { %v1685_v50 = vmul.f32 %v1680_v52, %v1668_v14  ;;  %v1588_v16 = vadd.f32 %v1584_v12, %v1487_v13  ;;  %v2606_v11 = vpack.c.bf16 %v2057_v10, %v2056_v40  ;;  %v2058_v12 = vld [vmem:[%s3274_s3 + $0xb8] sm:$0xff]  ;;  %v2059_v13 = vld [vmem:[%s3274_s3 + $0xc0] sm:$0xff]  ;;  %v2060_v52 = vld [vmem:[%s3274_s3 + $0xc8] sm:$0xff] }
 0x7c8   :  { %v1690_v17 = vadd.f32 %v1686_v48, %v1589_v15  ;;  %2603 = vmatprep.subr.bf16.mxu1 %v2602_v38  ;;  %v2610_v51 = vpack.c.bf16 %v2059_v13, %v2058_v12  ;;  %v2061_v48 = vld [vmem:[%s3274_s3 + $0xd0] sm:$0xff]  ;;  %v2258_v15 = vld [vmem:[%s3274_s3 + $0xe4] ss:$0 sm:$0xff]  ;;  %v2261_v12 = vld [vmem:[%s3274_s3 + $0xe5] ss:$0 sm:$0xff] }
 0x7c9   :  { %v1689_v18 = vadd.f32 %v1685_v50, %v1588_v16  ;;  %v2614_v14 = vpack.c.bf16 %v2061_v48, %v2060_v52 }
 0x7cf   :  { %v2496_v22 = vpop.f32.mrb[26].mxu0 }
 0x7d0   :  { %v1775_v25 = vmul.f32 %v2496_v22, %v1690_v17  ;;  %v1765_v23 = vpop.f32.mrb[27].mxu0 }
 0x7d1   :  { %v1774_v19 = vmul.f32 %v1765_v23, %v1689_v18 }
 0x7d2   :  { %v1777_v29 = vadd.f32 %v1775_v25, %v3059_v8 }
 0x7d3   :  { %v1776_v27 = vadd.f32 %v1774_v19, %v3062_v9 }
 0x7d5   :  { %2505 = vmatprep.mubr.msk.f32.mxu1 %vm114_vm2, %v1776_v27 }
 0x7d6   :  { %2506 = vmatmul.mubr.msk.f32.vlgmr.msra.gmra.mrb[18].mxu1 %vm114_vm2, %v1777_v29 }
 0x7d7   :  { %2605 = vmatpush3.bf16.msra.mxu1 %v2602_v38 }
 0x7d8   :  { %2607 = vmatprep.subr.bf16.mxu1 %v2606_v11 }
 0x7db   :  { %2609 = vmatpush3.bf16.msra.mxu1 %v2606_v11 }
 0x7dc   :  { %2611 = vmatprep.subr.bf16.mxu1 %v2610_v51 }
 0x7df   :  { %2613 = vmatpush3.bf16.msra.mxu1 %v2610_v51 }
 0x7e0   :  { %2615 = vmatprep.subr.bf16.mxu1 %v2614_v14 }
 0x7e3   :  { %2617 = vmatpush3.bf16.msra.mxu1 %v2614_v14 }
 0x8a9   :  { %v2507_v32 = vpop.f32.mrb[18].mxu1 }
 0x8aa   :  { %v1865_v34 = vadd.f32 %v2507_v32, %v2253_v31  ;;  %v1859_v35 = vpop.f32.mrb[19].mxu1 }
 0x8ab   :  { %v1860_v36 = vadd.f32 %v2253_v31, %v1859_v35 }
 0x8ac   :  { %v3194_v39 = vadd.f32 %v1865_v34, %v2753_v7 }
 0x8ad   :  { %v3197_v41 = vadd.f32 %v1860_v36, %v2751_v6 }
 0x8ae   :  { %v1875_v8 = vsel %vm114_vm2, %v3194_v39, 0.0 }
 0x8af   :  { %1876 = vadd.xlane.f32.xlu1 %v1875_v8  ;;  %v1872_v9 = vsel %vm114_vm2, %v3197_v41, 0.0 }
 0x8b0   :  { %1873 = vadd.xlane.f32.xlu0 %v1872_v9 }
 0x93c   :  { %v1877_v42 = vpop.xlane.xlu1 %1876 }
 0x93d   :  { %v1879_v44 = vmul.f32 0.03125, %v1877_v42  ;;  %v1874_v46 = vpop.xlane.xlu0 %1873 }
 0x93e   :  { %v1878_v47 = vmul.f32 0.03125, %v1874_v46 }
 0x93f   :  { %v1881_v49 = vsub.f32 %v3194_v39, %v1879_v44 }
 0x940   :  { %v1880_v7 = vsub.f32 %v3197_v41, %v1878_v47 }
 0x941   :  { %v1883_v37 = vmul.f32 %v1881_v49, %v1881_v49 }
 0x942   :  { %v1882_v53 = vmul.f32 %v1880_v7, %v1880_v7 }
 0x943   :  { %v1887_v26 = vsel %vm114_vm2, %v1883_v37, 0.0 }
 0x944   :  { %v1884_v6 = vsel %vm114_vm2, %v1882_v53, 0.0 }
 0x945   :  { %1885 = vadd.xlane.f32.xlu0 %v1884_v6 }
 0x949   :  { %1888 = vadd.xlane.f32.xlu0 %v1887_v26 }
 0x9d2   :  { %v1886_v59 = vpop.xlane.xlu0 %1885 }
 0x9d3   :  { %v1890_v43 = vmul.f32 0.03125, %v1886_v59 }
 0x9d5   :  { %v1892_v20 = vadd.f32 1e-05, %v1890_v43 }
 0x9d6   :  { %v1889_v55 = vpop.xlane.xlu0 %1888 }
 0x9d7   :  { %2666 = vrsqrt.f32 %v1892_v20  ;;  %v1891_v57 = vmul.f32 0.03125, %v1889_v55 }
 0x9d9   :  { %v1893_v21 = vadd.f32 1e-05, %v1891_v57 }
 0x9db   :  { %2668 = vrsqrt.f32 %v1893_v21 }
 0x9e1   :  { %v2667_v60 = vpop.eup %2666 }
 0x9e2   :  { %v1896_v62 = vmul.f32 %v2667_v60, %v1880_v7 }
 0x9e4   :  { %v1902_v0 = vmul.f32 %v2256_v61, %v1896_v62 }
 0x9e5   :  { %v2669_v1 = vpop.eup %2668 }
 0x9e6   :  { %v1897_v28 = vmul.f32 %v2669_v1, %v1881_v49  ;;  %v1908_v30 = vadd.f32 %v2257_v63, %v1902_v0  ;;  %v2706_v0 = vmov -1.0  }
 0x9e8   :  { %v1903_v2 = vmul.f32 %v2256_v61, %v1897_v28  ;;  %2516 = vmatprep.mubr.msk.f32.mxu0 %vm114_vm2, %v1908_v30 }
 0x9ea   :  { %v1909_v3 = vadd.f32 %v2257_v63, %v1903_v2 }
 0x9ec   :  { %2517 = vmatmul.mubr.msk.f32.vlgmr.msra.gmra.mrb[28].mxu0 %vm114_vm2, %v1909_v3  ;;  %vm2067_vm2 = vcmask 523264  }
 0xabf   :  { %v2518_v50 = vpop.f32.mrb[28].mxu0 }
 0xac0   :  { %v1997_v16 = vadd.f32 %v2518_v50, %v2258_v15  ;;  %v1991_v17 = vpop.f32.mrb[29].mxu0 }
 0xac1   :  { %v1992_v18 = vadd.f32 %v2258_v15, %v1991_v17 }
 0xac2   :  { %v2003_v22 = vmul.f32 0.70710677, %v1997_v16  ;;  %v2001_v40 = vmul.f32 0.5, %v1997_v16 }
 0xac3   :  { %v2002_v25 = vmul.f32 0.70710677, %v1992_v18  ;;  %v2000_v5 = vmul.f32 0.5, %v1992_v18 }
 0xac4   :  { %v2009_v23 = vand.u32 2147483647, %v2003_v22  ;;  %vm2005_vm0 = vcmp.ge.f32.partialorder %v2003_v22, 0.0 }
 0xac5   :  { %v2008_v19 = vand.u32 2147483647, %v2002_v25  ;;  %vm2004_vm1 = vcmp.ge.f32.partialorder %v2002_v25, 0.0  ;;  %v2007_v1 = vsel %vm2005_vm0, 1.0, %v2706_v0 }
 0xac6   :  { %v2011_v27 = vmul.f32 0.3275911, %v2009_v23  ;;  %v2037_v34 = vsub.f32 0.0, %v2009_v23  ;;  %v2006_v2 = vsel %vm2004_vm1, 1.0, %v2706_v0 }
 0xac7   :  { %v2010_v29 = vmul.f32 0.3275911, %v2008_v19  ;;  %v2036_v35 = vsub.f32 0.0, %v2008_v19 }
 0xac8   :  { %v2013_v31 = vadd.f32 1.0, %v2011_v27  ;;  %v2039_v8 = vmul.f32 %v2037_v34, %v2009_v23 }
 0xac9   :  { %v2012_v32 = vadd.f32 1.0, %v2010_v29  ;;  %v2038_v44 = vmul.f32 %v2036_v35, %v2008_v19 }
 0xaca   :  { %2670 = vrcp.f32 %v2013_v31  ;;  %v2042_v49 = vmul.f32 1.442695, %v2039_v8 }
 0xacb   :  { %2672 = vrcp.f32 %v2012_v32  ;;  %v2040_v6 = vmul.f32 1.442695, %v2038_v44 }
 0xacc   :  { %2674 = vpow2.f32 %v2042_v49 }
 0xacd   :  { %2676 = vpow2.f32 %v2040_v6 }
 0xad4   :  { %v2671_v36 = vpop.eup %2670 }
 0xad5   :  { %v2673_v9 = vpop.eup %2672  ;;  %v2019_v42 = vmul.f32 1.0614054, %v2671_v36 }
 0xad6   :  { %v2018_v46 = vmul.f32 1.0614054, %v2673_v9  ;;  %v2675_v57 = vpop.eup %2674 }
 0xad7   :  { %v2021_v47 = vadd.f32 -1.4531521, %v2019_v42  ;;  %v2677_v60 = vpop.eup %2676 }
 0xad8   :  { %v2020_v7 = vadd.f32 -1.4531521, %v2018_v46 }
 0xad9   :  { %v2023_v53 = vmul.f32 %v2671_v36, %v2021_v47 }
 0xada   :  { %v2022_v37 = vmul.f32 %v2673_v9, %v2020_v7 }
 0xadb   :  { %v2025_v26 = vadd.f32 1.4214138, %v2023_v53 }
 0xadc   :  { %v2024_v54 = vadd.f32 1.4214138, %v2022_v37 }
 0xadd   :  { %v2027_v56 = vmul.f32 %v2671_v36, %v2025_v26 }
 0xade   :  { %v2026_v33 = vmul.f32 %v2673_v9, %v2024_v54 }
 0xadf   :  { %v2029_v24 = vadd.f32 -0.28449672, %v2027_v56 }
 0xae0   :  { %v2028_v58 = vadd.f32 -0.28449672, %v2026_v33 }
 0xae1   :  { %v2031_v45 = vmul.f32 %v2671_v36, %v2029_v24 }
 0xae2   :  { %v2030_v59 = vmul.f32 %v2673_v9, %v2028_v58 }
 0xae3   :  { %v2033_v43 = vadd.f32 0.2548296, %v2031_v45 }
 0xae4   :  { %v2032_v20 = vadd.f32 0.2548296, %v2030_v59 }
 0xae5   :  { %v2035_v55 = vmul.f32 %v2671_v36, %v2033_v43 }
 0xae6   :  { %v2034_v21 = vmul.f32 %v2673_v9, %v2032_v20 }
 0xae7   :  { %v2045_v61 = vmul.f32 %v2675_v57, %v2035_v55 }
 0xae8   :  { %v2044_v62 = vmul.f32 %v2677_v60, %v2034_v21 }
 0xae9   :  { %v2047_v63 = vsub.f32 1.0, %v2045_v61 }
 0xaea   :  { %v2046_v28 = vsub.f32 1.0, %v2044_v62 }
 0xaeb   :  { %v2049_v30 = vmul.f32 %v2047_v63, %v2007_v1 }
 0xaec   :  { %v2048_v3 = vmul.f32 %v2046_v28, %v2006_v2 }
 0xaed   :  { %v2051_v4 = vadd.f32 1.0, %v2049_v30 }
 0xaee   :  { %v2050_v38 = vadd.f32 1.0, %v2048_v3 }
 0xaef   :  { %v2053_v11 = vmul.f32 %v2051_v4, %v2001_v40 }
 0xaf0   :  { %v2052_v10 = vmul.f32 %v2050_v38, %v2000_v5 }
 0xaf2   :  { %2535 = vmatprep.mubr.msk.f32.mxu1 %vm2067_vm2, %v2052_v10 }
 0xaf3   :  { %2536 = vmatmul.mubr.msk.f32.vlgmr.msra.gmra.mrb[20].mxu1 %vm2067_vm2, %v2053_v11 }
 0xbc6   :  { %v2537_v13 = vpop.f32.mrb[20].mxu1 }
 0xbc7   :  { %v2146_v51 = vadd.f32 %v2537_v13, %v2261_v12  ;;  %v2140_v52 = vpop.f32.mrb[21].mxu1 }
 0xbc8   :  { %v2141_v48 = vadd.f32 %v2261_v12, %v2140_v52 }
 0xbc9   :  { %v2150_v14 = vadd.f32 %v2146_v51, %v3194_v39 }
 0xbca   :  { %v2149_v15 = vadd.f32 %v2141_v48, %v3197_v41 }
 0xbcb   :  { %2152 = vst [vmem:[#allocation2 + $0x8] sm:$0xff] %v2150_v14 }
 0xbcc   :  { %2151 = vst [vmem:[#allocation2] sm:$0xff] %v2149_v15 }
 0xbcd   :  { %2689 = shalt.err (!%p2686_p4)
}
 0xbce   :  { %s2690_s2 = scalar_lea.hbm %s3275_s4, 256 }
 0xbcf   :  { %p2691_p5 = scmp.ne.s32.totalorder %s3275_s4, %s2690_s2  ;;  %p2694_p6 = scmp.lt.u32.totalorder %s2690_s2, %s3275_s4 }
 0xbd1   :  { %p2696_p7 = pnand %p2694_p6, %p2691_p5 }
 0xbd3   :  { %2699 = shalt.err (!%p2696_p7)
}
 0xbd4   :  { %s2708_s28 = smov 128   ;;  %s2709_s29 = smov 8  }
 0xbd5   :  { %2164 = dma.vmem_to_hbm [thread:$0]  %s2159_s0, 256, %s3275_s4, [#allocation3], %s2708_s28, %s2708_s28, %s2709_s29  }
 0xbd6   :  { %2700 = dma.done.wait [#allocation3], 256  }
 0xbd7   :  { %2701 = vsyncadd [#allocation3], 4294967040 }
 0xbd8   :  { %2168 = vsyncpa [#allocation3], 1 }

</bundles_post_ra>
